<compile_context>
chip_gen: v5e
topology: v5e:2x2
jax: 0.10.0
libtpu: 0.0.40
codegen_flags: <defaults>
</compile_context>

<pallas_src>
import functools

import jax
import jax.numpy as jnp
from jax import lax
from jax.experimental import pallas as pl
from jax.experimental.pallas import tpu as pltpu


# ----------------------------------------------------------------------------
# In-kernel multi-head self-attention for one (S, H) sequence.
# Softmax scale is pre-folded into the Q rows of wqkv (host-side).
# Head outputs are accumulated straight through the output projection:
#   out = sum_h softmax(q_h k_h^T + bias) v_h @ wo[:, h_slice]^T + bo
# ----------------------------------------------------------------------------
def _mha(x, key_bias, wqkv, bqkv, wo, bo, num_heads):
    S, H = x.shape
    hd = H // num_heads
    qkv = lax.dot_general(x, wqkv, (((1,), (1,)), ((), ())),
                          preferred_element_type=jnp.float32) + bqkv      # (S, 3H)
    q = qkv[:, 0 * H:1 * H]
    k = qkv[:, 1 * H:2 * H]
    v = qkv[:, 2 * H:3 * H]

    out = None
    for h in range(num_heads):
        sl = slice(h * hd, (h + 1) * hd)
        s = lax.dot_general(q[:, sl], k[:, sl], (((1,), (1,)), ((), ())),
                            preferred_element_type=jnp.float32)           # (S, S)
        if key_bias is not None:
            s = s + key_bias                                               # (1, S) bcast
        s = s - jnp.max(s, axis=-1, keepdims=True)
        p = jnp.exp(s)
        p = p * pl.reciprocal(jnp.sum(p, axis=-1, keepdims=True), approx=True)
        head = jnp.dot(p, v[:, sl], preferred_element_type=jnp.float32)   # (S, hd)
        contrib = lax.dot_general(head, wo[:, sl], (((1,), (1,)), ((), ())),
                                  preferred_element_type=jnp.float32)     # (S, H)
        out = contrib if out is None else out + contrib
    return out + bo


# ----------------------------------------------------------------------------
# Fused kernel: one batch element per grid step, everything resident in VMEM.
# ----------------------------------------------------------------------------
def _fused_kernel(eac_ref, acm_ref, am_ref, hog_ref, om_ref, hgo_ref,
                  t_wqkv_ref, t_bqkv_ref, t_wo_ref, t_bo_ref,
                  g_wqkv_ref, g_bqkv_ref, g_wo_ref, g_bo_ref,
                  w1a_ref, w1b_ref, w1c_ref, b1_ref, w2_ref, b2_ref,
                  out_ref, *, num_heads):
    f32 = jnp.float32

    # ---- 1) action candidate repr: masked mean over token axis L ------------
    eac = eac_ref[0].astype(f32)                    # (A, L, H)
    acm = acm_ref[0].astype(f32)                    # (A, L, 1)
    acr_num = jnp.sum(eac * acm, axis=1)            # (A, H)
    acr_den = jnp.sum(acm, axis=1)                  # (A, 1)
    acr = acr_num / acr_den                         # (A, H)

    # ---- 2) observation repr: self-attention (key padding) + masked mean ----
    om = om_ref[0].astype(f32)                      # (1, S), 1 = attend
    key_bias = jnp.where(om > 0.0, 0.0, -1e30).astype(f32)
    obs_attn = _mha(hog_ref[0].astype(f32), key_bias,
                    t_wqkv_ref[...], t_bqkv_ref[...],
                    t_wo_ref[...], t_bo_ref[...], num_heads)               # (S, H)
    o_num = lax.dot_general(om, obs_attn, (((1,), (0,)), ((), ())),
                            preferred_element_type=f32)                   # (1, H)
    o_den = jnp.sum(om, axis=1, keepdims=True)                            # (1, 1)
    obs_repr = o_num / o_den                                              # (1, H)

    # ---- 3) graph repr: self-attention (no mask) + plain mean ---------------
    hgo = hgo_ref[0].astype(f32)                    # (N, H)
    n_node = hgo.shape[0]
    graph_attn = _mha(hgo, None,
                      g_wqkv_ref[...], g_bqkv_ref[...],
                      g_wo_ref[...], g_bo_ref[...], num_heads)            # (N, H)
    graph_repr = jnp.sum(graph_attn, axis=0, keepdims=True) * (1.0 / n_node)  # (1, H)

    # ---- 4) scorer: (acr | obs | graph) -> Linear+ReLU -> mask -> Linear -> mask
    #      w1 split into three (H, H) blocks; obs/graph terms are a (1, H) bias row.
    bias_row = (lax.dot_general(obs_repr, w1b_ref[...], (((1,), (1,)), ((), ())),
                                preferred_element_type=f32)
                + lax.dot_general(graph_repr, w1c_ref[...], (((1,), (1,)), ((), ())),
                                  preferred_element_type=f32)
                + b1_ref[...])                                            # (1, H)
    h1 = lax.dot_general(acr, w1a_ref[...], (((1,), (1,)), ((), ())),
                         preferred_element_type=f32) + bias_row           # (A, H)
    h1 = jnp.maximum(h1, 0.0)

    # lane-dense (1, A) scores: w2 (1,H) contracted against h1 (A,H)
    s_raw = lax.dot_general(w2_ref[...], h1, (((1,), (1,)), ((), ())),
                            preferred_element_type=f32)                   # (1, A)
    am = am_ref[0].astype(f32)                                            # (1, A)
    # faithful to: (h1 * am) @ w2.T + b2, then * am   ==  am*(am*s_raw + b2)
    scores = am * (am * s_raw + b2_ref[...])
    out_ref[0] = scores.astype(out_ref.dtype)


# ----------------------------------------------------------------------------
# Wrapper: host-side weight prep + single pallas_call
# ----------------------------------------------------------------------------
def action_scorer_forward(params, enc_action_cands, action_cand_mask, action_mask,
                          h_og, h_go, obs_mask, *, num_heads):
    B, A, L, H = enc_action_cands.shape
    S = h_og.shape[1]
    N = h_go.shape[1]
    hd = H // num_heads
    scale = 1.0 / float(hd) ** 0.5
    f32 = jnp.float32

    def prep_attn(wqkv, bqkv):
        # fold softmax scale into the Q rows of in_proj (weight + bias)
        qscale = jnp.concatenate([jnp.full((H, 1), scale, wqkv.dtype),
                                  jnp.ones((2 * H, 1), wqkv.dtype)], axis=0)
        return wqkv * qscale, (bqkv * qscale[:, 0]).reshape(1, 3 * H)

    t_wqkv, t_bqkv = prep_attn(params["text_wqkv"], params["text_bqkv"])
    g_wqkv, g_bqkv = prep_attn(params["graph_wqkv"], params["graph_bqkv"])
    w1 = params["w1"]
    w1a, w1b, w1c = w1[:, :H], w1[:, H:2 * H], w1[:, 2 * H:]

    acm = action_cand_mask.reshape(B, A, L, 1).astype(f32)   # lane-broadcastable
    am = action_mask.reshape(B, 1, A).astype(f32)            # lane-major
    om = obs_mask.reshape(B, 1, S).astype(f32)               # lane-major

    kernel = functools.partial(_fused_kernel, num_heads=num_heads)
    out = pl.pallas_call(
        kernel,
        out_shape=jax.ShapeDtypeStruct((B, 1, A), f32),
        grid=(B,),
        in_specs=[
            pl.BlockSpec((1, A, L, H), lambda i: (i, 0, 0, 0)),   # enc_action_cands
            pl.BlockSpec((1, A, L, 1), lambda i: (i, 0, 0, 0)),   # action_cand_mask
            pl.BlockSpec((1, 1, A), lambda i: (i, 0, 0)),         # action_mask (lane-major)
            pl.BlockSpec((1, S, H), lambda i: (i, 0, 0)),         # h_og
            pl.BlockSpec((1, 1, S), lambda i: (i, 0, 0)),         # obs_mask (lane-major)
            pl.BlockSpec((1, N, H), lambda i: (i, 0, 0)),         # h_go
            pl.BlockSpec((3 * H, H), lambda i: (0, 0)),           # text in_proj W (scaled)
            pl.BlockSpec((1, 3 * H), lambda i: (0, 0)),           # text in_proj b (scaled)
            pl.BlockSpec((H, H), lambda i: (0, 0)),               # text out_proj W
            pl.BlockSpec((1, H), lambda i: (0, 0)),               # text out_proj b
            pl.BlockSpec((3 * H, H), lambda i: (0, 0)),           # graph in_proj W (scaled)
            pl.BlockSpec((1, 3 * H), lambda i: (0, 0)),           # graph in_proj b (scaled)
            pl.BlockSpec((H, H), lambda i: (0, 0)),               # graph out_proj W
            pl.BlockSpec((1, H), lambda i: (0, 0)),               # graph out_proj b
            pl.BlockSpec((H, H), lambda i: (0, 0)),               # w1a (acr block)
            pl.BlockSpec((H, H), lambda i: (0, 0)),               # w1b (obs block)
            pl.BlockSpec((H, H), lambda i: (0, 0)),               # w1c (graph block)
            pl.BlockSpec((1, H), lambda i: (0, 0)),               # b1
            pl.BlockSpec((1, H), lambda i: (0, 0)),               # w2
            pl.BlockSpec((1, 1), lambda i: (0, 0)),               # b2
        ],
        out_specs=pl.BlockSpec((1, 1, A), lambda i: (i, 0, 0)),
        compiler_params=pltpu.CompilerParams(dimension_semantics=("parallel",)),
    )(enc_action_cands, acm, am, h_og, om, h_go,
      t_wqkv, t_bqkv, params["text_wo"], params["text_bo"].reshape(1, H),
      g_wqkv, g_bqkv, params["graph_wo"], params["graph_bo"].reshape(1, H),
      w1a, w1b, w1c, params["b1"].reshape(1, H), params["w2"],
      params["b2"].reshape(1, 1))
    return out[:, 0, :]


# ----------------------------------------------------------------------------
# Pure-JAX reference (for verification only)
# ----------------------------------------------------------------------------
def _ref_masked_mean(x, mask):
    return jnp.sum(x * mask[..., None], axis=1) / jnp.sum(mask, axis=1, keepdims=True)


def _ref_mha(x, key_valid, wqkv, bqkv, wo, bo, nh):
    B, S, H = x.shape
    hd = H // nh
    qkv = x @ wqkv.T + bqkv
    q, k, v = jnp.split(qkv, 3, axis=-1)
    sp = lambda t: t.reshape(B, S, nh, hd).transpose(0, 2, 1, 3)
    q, k, v = sp(q), sp(k), sp(v)
    s = jnp.einsum("bhqd,bhkd->bhqk", q, k) / jnp.sqrt(float(hd))
    bias = jnp.where(key_valid[:, None, None, :] > 0, 0.0, -1e30)
    p = jax.nn.softmax(s + bias, axis=-1)
    o = jnp.einsum("bhqk,bhkd->bhqd", p, v).transpose(0, 2, 1, 3).reshape(B, S, H)
    return o @ wo.T + bo


def _ref_forward(params, eac, acm, am, h_og, h_go, om, nh):
    B, A, L, H = eac.shape
    acr = _ref_masked_mean(eac.reshape(B * A, L, H), acm.reshape(B * A, L)).reshape(B, A, H)
    obs = _ref_masked_mean(_ref_mha(h_og, om, params["text_wqkv"], params["text_bqkv"],
                                    params["text_wo"], params["text_bo"], nh), om)
    gra = _ref_mha(h_go, jnp.ones((B, h_go.shape[1]), h_go.dtype),
                   params["graph_wqkv"], params["graph_bqkv"],
                   params["graph_wo"], params["graph_bo"], nh).mean(axis=1)
    cat = jnp.concatenate([acr,
                           jnp.broadcast_to(obs[:, None, :], (B, A, H)),
                           jnp.broadcast_to(gra[:, None, :], (B, A, H))], axis=-1)
    h1 = jax.nn.relu(cat @ params["w1"].T + params["b1"]) * am[..., None]
    return (h1 @ params["w2"].T + params["b2"])[..., 0] * am


# ----------------------------------------------------------------------------
if __name__ == "__main__":
    B, A, L, H, NH = 2, 4, 8, 32, 4
    S_OBS, N_NODE = 16, 8

    key = jax.random.PRNGKey(0)
    ks = jax.random.split(key, 20)

    enc_action_cands = jax.random.normal(ks[0], (B, A, L, H), jnp.float32)
    action_cand_mask = (jax.random.uniform(ks[1], (B, A, L)) > 0.3).astype(jnp.float32)
    action_cand_mask = action_cand_mask.at[..., 0].set(1.0)   # guarantee >=1 valid token
    action_mask = (jax.random.uniform(ks[2], (B, A)) > 0.3).astype(jnp.float32)
    h_og = jax.random.normal(ks[3], (B, S_OBS, H), jnp.float32)
    h_go = jax.random.normal(ks[4], (B, N_NODE, H), jnp.float32)
    obs_mask = (jax.random.uniform(ks[5], (B, S_OBS)) > 0.3).astype(jnp.float32)
    obs_mask = obs_mask.at[..., 0].set(1.0)

    n = lambda k, s: 0.1 * jax.random.normal(k, s, jnp.float32)
    params = {
        "text_wqkv": n(ks[6], (3 * H, H)),  "text_bqkv": n(ks[7], (3 * H,)),
        "text_wo":   n(ks[8], (H, H)),      "text_bo":   n(ks[9], (H,)),
        "graph_wqkv": n(ks[10], (3 * H, H)), "graph_bqkv": n(ks[11], (3 * H,)),
        "graph_wo":   n(ks[12], (H, H)),     "graph_bo":   n(ks[13], (H,)),
        "w1": n(ks[14], (H, 3 * H)), "b1": n(ks[15], (H,)),
        "w2": n(ks[16], (1, H)),     "b2": n(ks[17], (1,)),
    }

    scores = action_scorer_forward(params, enc_action_cands, action_cand_mask,
                                   action_mask, h_og, h_go, obs_mask, num_heads=NH)
    scores = jax.block_until_ready(scores)
    assert scores.shape == (B, A), scores.shape

    ref = _ref_forward(params, enc_action_cands, action_cand_mask, action_mask,
                       h_og, h_go, obs_mask, NH)
    assert jnp.allclose(scores, ref, rtol=5e-2, atol=5e-2), (scores, ref)

    print("KERNEL_OK")
</pallas_src>

<mosaic_0001>
module attributes {stable_mosaic.version = 11 : i64} {
  func.func @_fused_kernel(%arg0: i32, %arg1: memref<1x4x8x32xf32, #tpu.memory_space<vmem>>, %arg2: memref<1x4x8x1xf32, #tpu.memory_space<vmem>>, %arg3: memref<1x1x4xf32, #tpu.memory_space<vmem>>, %arg4: memref<1x16x32xf32, #tpu.memory_space<vmem>>, %arg5: memref<1x1x16xf32, #tpu.memory_space<vmem>>, %arg6: memref<1x8x32xf32, #tpu.memory_space<vmem>>, %arg7: memref<96x32xf32, #tpu.memory_space<vmem>>, %arg8: memref<1x96xf32, #tpu.memory_space<vmem>>, %arg9: memref<32x32xf32, #tpu.memory_space<vmem>>, %arg10: memref<1x32xf32, #tpu.memory_space<vmem>>, %arg11: memref<96x32xf32, #tpu.memory_space<vmem>>, %arg12: memref<1x96xf32, #tpu.memory_space<vmem>>, %arg13: memref<32x32xf32, #tpu.memory_space<vmem>>, %arg14: memref<1x32xf32, #tpu.memory_space<vmem>>, %arg15: memref<32x32xf32, #tpu.memory_space<vmem>>, %arg16: memref<32x32xf32, #tpu.memory_space<vmem>>, %arg17: memref<32x32xf32, #tpu.memory_space<vmem>>, %arg18: memref<1x32xf32, #tpu.memory_space<vmem>>, %arg19: memref<1x32xf32, #tpu.memory_space<vmem>>, %arg20: memref<1x1xf32, #tpu.memory_space<vmem>>, %arg21: memref<1x1x4xf32, #tpu.memory_space<vmem>>) attributes {dimension_semantics = [#tpu.dimension_semantics<parallel>], iteration_bounds = array<i64: 2>, scalar_prefetch = 0 : i64, scratch_operands = 0 : i64, tpu.core_type = #tpu.core_type<tc>, window_params = [{transform_indices = @transform_0, window_bounds = array<i64: 1, 4, 8, 32>}, {transform_indices = @transform_1, window_bounds = array<i64: 1, 4, 8, 1>}, {transform_indices = @transform_2, window_bounds = array<i64: 1, 1, 4>}, {transform_indices = @transform_3, window_bounds = array<i64: 1, 16, 32>}, {transform_indices = @transform_4, window_bounds = array<i64: 1, 1, 16>}, {transform_indices = @transform_5, window_bounds = array<i64: 1, 8, 32>}, {pipeline_mode = #tpu.pipeline_mode<synchronous>, transform_indices = @transform_6, window_bounds = array<i64: 96, 32>}, {pipeline_mode = #tpu.pipeline_mode<synchronous>, transform_indices = @transform_7, window_bounds = array<i64: 1, 96>}, {pipeline_mode = #tpu.pipeline_mode<synchronous>, transform_indices = @transform_8, window_bounds = array<i64: 32, 32>}, {pipeline_mode = #tpu.pipeline_mode<synchronous>, transform_indices = @transform_9, window_bounds = array<i64: 1, 32>}, {pipeline_mode = #tpu.pipeline_mode<synchronous>, transform_indices = @transform_10, window_bounds = array<i64: 96, 32>}, {pipeline_mode = #tpu.pipeline_mode<synchronous>, transform_indices = @transform_11, window_bounds = array<i64: 1, 96>}, {pipeline_mode = #tpu.pipeline_mode<synchronous>, transform_indices = @transform_12, window_bounds = array<i64: 32, 32>}, {pipeline_mode = #tpu.pipeline_mode<synchronous>, transform_indices = @transform_13, window_bounds = array<i64: 1, 32>}, {pipeline_mode = #tpu.pipeline_mode<synchronous>, transform_indices = @transform_14, window_bounds = array<i64: 32, 32>}, {pipeline_mode = #tpu.pipeline_mode<synchronous>, transform_indices = @transform_15, window_bounds = array<i64: 32, 32>}, {pipeline_mode = #tpu.pipeline_mode<synchronous>, transform_indices = @transform_16, window_bounds = array<i64: 32, 32>}, {pipeline_mode = #tpu.pipeline_mode<synchronous>, transform_indices = @transform_17, window_bounds = array<i64: 1, 32>}, {pipeline_mode = #tpu.pipeline_mode<synchronous>, transform_indices = @transform_18, window_bounds = array<i64: 1, 32>}, {pipeline_mode = #tpu.pipeline_mode<synchronous>, transform_indices = @transform_19, window_bounds = array<i64: 1, 1>}, {transform_indices = @transform_20, window_bounds = array<i64: 1, 1, 4>}]} {
    %c0 = arith.constant 0 : index
    %c0_0 = arith.constant 0 : index
    %c0_1 = arith.constant 0 : index
    %c0_2 = arith.constant 0 : index
    %0 = vector.load %arg1[%c0, %c0_0, %c0_1, %c0_2] : memref<1x4x8x32xf32, #tpu.memory_space<vmem>>, vector<1x4x8x32xf32>
    %1 = vector.shape_cast %0 : vector<1x4x8x32xf32> to vector<4x8x32xf32>
    %c0_3 = arith.constant 0 : index
    %c0_4 = arith.constant 0 : index
    %c0_5 = arith.constant 0 : index
    %c0_6 = arith.constant 0 : index
    %2 = vector.load %arg2[%c0_3, %c0_4, %c0_5, %c0_6] : memref<1x4x8x1xf32, #tpu.memory_space<vmem>>, vector<1x4x8x1xf32>
    %3 = vector.shape_cast %2 : vector<1x4x8x1xf32> to vector<4x8x1xf32>
    %4 = vector.broadcast %3 : vector<4x8x1xf32> to vector<4x8x32xf32>
    %5 = arith.mulf %1, %4 : vector<4x8x32xf32>
    %cst = arith.constant dense<0.000000e+00> : vector<4x32xf32>
    %6 = vector.multi_reduction <add>, %5, %cst [1] : vector<4x8x32xf32> to vector<4x32xf32>
    %cst_7 = arith.constant dense<0.000000e+00> : vector<4x1xf32>
    %7 = vector.multi_reduction <add>, %3, %cst_7 [1] : vector<4x8x1xf32> to vector<4x1xf32>
    %8 = vector.broadcast %7 : vector<4x1xf32> to vector<4x32xf32>
    %9 = arith.divf %6, %8 : vector<4x32xf32>
    %c0_8 = arith.constant 0 : index
    %c0_9 = arith.constant 0 : index
    %c0_10 = arith.constant 0 : index
    %10 = vector.load %arg5[%c0_8, %c0_9, %c0_10] : memref<1x1x16xf32, #tpu.memory_space<vmem>>, vector<1x1x16xf32>
    %11 = vector.shape_cast %10 : vector<1x1x16xf32> to vector<1x16xf32>
    %cst_11 = arith.constant 0.000000e+00 : f32
    %12 = vector.broadcast %cst_11 : f32 to vector<1x16xf32>
    %13 = arith.cmpf ogt, %11, %12 : vector<1x16xf32>
    %cst_12 = arith.constant 0.000000e+00 : f32
    %cst_13 = arith.constant -1.000000e+30 : f32
    %14 = vector.broadcast %cst_12 : f32 to vector<1x16xf32>
    %15 = vector.broadcast %cst_13 : f32 to vector<1x16xf32>
    %16 = arith.select %13, %14, %15 : vector<1x16xi1>, vector<1x16xf32>
    %c0_14 = arith.constant 0 : index
    %c0_15 = arith.constant 0 : index
    %c0_16 = arith.constant 0 : index
    %17 = vector.load %arg4[%c0_14, %c0_15, %c0_16] : memref<1x16x32xf32, #tpu.memory_space<vmem>>, vector<1x16x32xf32>
    %18 = vector.shape_cast %17 : vector<1x16x32xf32> to vector<16x32xf32>
    %c0_17 = arith.constant 0 : index
    %c0_18 = arith.constant 0 : index
    %19 = vector.load %arg7[%c0_17, %c0_18] : memref<96x32xf32, #tpu.memory_space<vmem>>, vector<96x32xf32>
    %c0_19 = arith.constant 0 : index
    %c0_20 = arith.constant 0 : index
    %20 = vector.load %arg8[%c0_19, %c0_20] : memref<1x96xf32, #tpu.memory_space<vmem>>, vector<1x96xf32>
    %c0_21 = arith.constant 0 : index
    %c0_22 = arith.constant 0 : index
    %21 = vector.load %arg9[%c0_21, %c0_22] : memref<32x32xf32, #tpu.memory_space<vmem>>, vector<32x32xf32>
    %c0_23 = arith.constant 0 : index
    %c0_24 = arith.constant 0 : index
    %22 = vector.load %arg10[%c0_23, %c0_24] : memref<1x32xf32, #tpu.memory_space<vmem>>, vector<1x32xf32>
    %cst_25 = arith.constant dense<0.000000e+00> : vector<16x96xf32>
    %23 = tpu.matmul %18, %19, %cst_25 {dimension_numbers = #tpu.dot_dimension_numbers<[1], [1], [0], [0], [0, 0, 1, 0], [], []>} : vector<16x32xf32>, vector<96x32xf32>, vector<16x96xf32> -> vector<16x96xf32>
    %24 = vector.broadcast %20 : vector<1x96xf32> to vector<16x96xf32>
    %25 = arith.addf %23, %24 : vector<16x96xf32>
    %26 = vector.extract_strided_slice %25 {offsets = [0, 0], sizes = [16, 32], strides = [1, 1]} : vector<16x96xf32> to vector<16x32xf32>
    %27 = vector.extract_strided_slice %25 {offsets = [0, 32], sizes = [16, 32], strides = [1, 1]} : vector<16x96xf32> to vector<16x32xf32>
    %28 = vector.extract_strided_slice %25 {offsets = [0, 64], sizes = [16, 32], strides = [1, 1]} : vector<16x96xf32> to vector<16x32xf32>
    %29 = vector.extract_strided_slice %26 {offsets = [0, 0], sizes = [16, 8], strides = [1, 1]} : vector<16x32xf32> to vector<16x8xf32>
    %30 = vector.extract_strided_slice %27 {offsets = [0, 0], sizes = [16, 8], strides = [1, 1]} : vector<16x32xf32> to vector<16x8xf32>
    %cst_26 = arith.constant dense<0.000000e+00> : vector<16x16xf32>
    %31 = tpu.matmul %29, %30, %cst_26 {dimension_numbers = #tpu.dot_dimension_numbers<[1], [1], [0], [0], [0, 0, 1, 0], [], []>} : vector<16x8xf32>, vector<16x8xf32>, vector<16x16xf32> -> vector<16x16xf32>
    %32 = vector.broadcast %16 : vector<1x16xf32> to vector<16x16xf32>
    %33 = arith.addf %31, %32 : vector<16x16xf32>
    %cst_27 = arith.constant dense<0xFF800000> : vector<16xf32>
    %34 = vector.multi_reduction <maximumf>, %33, %cst_27 [1] : vector<16x16xf32> to vector<16xf32>
    %35 = vector.shape_cast %34 : vector<16xf32> to vector<16x1xf32>
    %36 = vector.broadcast %35 : vector<16x1xf32> to vector<16x16xf32>
    %37 = arith.subf %33, %36 : vector<16x16xf32>
    %38 = math.exp %37 : vector<16x16xf32>
    %cst_28 = arith.constant dense<0.000000e+00> : vector<16xf32>
    %39 = vector.multi_reduction <add>, %38, %cst_28 [1] : vector<16x16xf32> to vector<16xf32>
    %40 = vector.shape_cast %39 : vector<16xf32> to vector<16x1xf32>
    %41 = tpu.reciprocal %40 {approx = true} : vector<16x1xf32> -> vector<16x1xf32>
    %42 = vector.broadcast %41 : vector<16x1xf32> to vector<16x16xf32>
    %43 = arith.mulf %38, %42 : vector<16x16xf32>
    %44 = vector.extract_strided_slice %28 {offsets = [0, 0], sizes = [16, 8], strides = [1, 1]} : vector<16x32xf32> to vector<16x8xf32>
    %cst_29 = arith.constant dense<0.000000e+00> : vector<16x8xf32>
    %45 = tpu.matmul %43, %44, %cst_29 {dimension_numbers = #tpu.dot_dimension_numbers<[1], [0], [0], [1], [0, 0, 1, 1], [], []>} : vector<16x16xf32>, vector<16x8xf32>, vector<16x8xf32> -> vector<16x8xf32>
    %46 = vector.extract_strided_slice %21 {offsets = [0, 0], sizes = [32, 8], strides = [1, 1]} : vector<32x32xf32> to vector<32x8xf32>
    %cst_30 = arith.constant dense<0.000000e+00> : vector<16x32xf32>
    %47 = tpu.matmul %45, %46, %cst_30 {dimension_numbers = #tpu.dot_dimension_numbers<[1], [1], [0], [0], [0, 0, 1, 0], [], []>} : vector<16x8xf32>, vector<32x8xf32>, vector<16x32xf32> -> vector<16x32xf32>
    %48 = vector.extract_strided_slice %26 {offsets = [0, 8], sizes = [16, 8], strides = [1, 1]} : vector<16x32xf32> to vector<16x8xf32>
    %49 = vector.extract_strided_slice %27 {offsets = [0, 8], sizes = [16, 8], strides = [1, 1]} : vector<16x32xf32> to vector<16x8xf32>
    %cst_31 = arith.constant dense<0.000000e+00> : vector<16x16xf32>
    %50 = tpu.matmul %48, %49, %cst_31 {dimension_numbers = #tpu.dot_dimension_numbers<[1], [1], [0], [0], [0, 0, 1, 0], [], []>} : vector<16x8xf32>, vector<16x8xf32>, vector<16x16xf32> -> vector<16x16xf32>
    %51 = vector.broadcast %16 : vector<1x16xf32> to vector<16x16xf32>
    %52 = arith.addf %50, %51 : vector<16x16xf32>
    %cst_32 = arith.constant dense<0xFF800000> : vector<16xf32>
    %53 = vector.multi_reduction <maximumf>, %52, %cst_32 [1] : vector<16x16xf32> to vector<16xf32>
    %54 = vector.shape_cast %53 : vector<16xf32> to vector<16x1xf32>
    %55 = vector.broadcast %54 : vector<16x1xf32> to vector<16x16xf32>
    %56 = arith.subf %52, %55 : vector<16x16xf32>
    %57 = math.exp %56 : vector<16x16xf32>
    %cst_33 = arith.constant dense<0.000000e+00> : vector<16xf32>
    %58 = vector.multi_reduction <add>, %57, %cst_33 [1] : vector<16x16xf32> to vector<16xf32>
    %59 = vector.shape_cast %58 : vector<16xf32> to vector<16x1xf32>
    %60 = tpu.reciprocal %59 {approx = true} : vector<16x1xf32> -> vector<16x1xf32>
    %61 = vector.broadcast %60 : vector<16x1xf32> to vector<16x16xf32>
    %62 = arith.mulf %57, %61 : vector<16x16xf32>
    %63 = vector.extract_strided_slice %28 {offsets = [0, 8], sizes = [16, 8], strides = [1, 1]} : vector<16x32xf32> to vector<16x8xf32>
    %cst_34 = arith.constant dense<0.000000e+00> : vector<16x8xf32>
    %64 = tpu.matmul %62, %63, %cst_34 {dimension_numbers = #tpu.dot_dimension_numbers<[1], [0], [0], [1], [0, 0, 1, 1], [], []>} : vector<16x16xf32>, vector<16x8xf32>, vector<16x8xf32> -> vector<16x8xf32>
    %65 = vector.extract_strided_slice %21 {offsets = [0, 8], sizes = [32, 8], strides = [1, 1]} : vector<32x32xf32> to vector<32x8xf32>
    %cst_35 = arith.constant dense<0.000000e+00> : vector<16x32xf32>
    %66 = tpu.matmul %64, %65, %cst_35 {dimension_numbers = #tpu.dot_dimension_numbers<[1], [1], [0], [0], [0, 0, 1, 0], [], []>} : vector<16x8xf32>, vector<32x8xf32>, vector<16x32xf32> -> vector<16x32xf32>
    %67 = arith.addf %47, %66 : vector<16x32xf32>
    %68 = vector.extract_strided_slice %26 {offsets = [0, 16], sizes = [16, 8], strides = [1, 1]} : vector<16x32xf32> to vector<16x8xf32>
    %69 = vector.extract_strided_slice %27 {offsets = [0, 16], sizes = [16, 8], strides = [1, 1]} : vector<16x32xf32> to vector<16x8xf32>
    %cst_36 = arith.constant dense<0.000000e+00> : vector<16x16xf32>
    %70 = tpu.matmul %68, %69, %cst_36 {dimension_numbers = #tpu.dot_dimension_numbers<[1], [1], [0], [0], [0, 0, 1, 0], [], []>} : vector<16x8xf32>, vector<16x8xf32>, vector<16x16xf32> -> vector<16x16xf32>
    %71 = vector.broadcast %16 : vector<1x16xf32> to vector<16x16xf32>
    %72 = arith.addf %70, %71 : vector<16x16xf32>
    %cst_37 = arith.constant dense<0xFF800000> : vector<16xf32>
    %73 = vector.multi_reduction <maximumf>, %72, %cst_37 [1] : vector<16x16xf32> to vector<16xf32>
    %74 = vector.shape_cast %73 : vector<16xf32> to vector<16x1xf32>
    %75 = vector.broadcast %74 : vector<16x1xf32> to vector<16x16xf32>
    %76 = arith.subf %72, %75 : vector<16x16xf32>
    %77 = math.exp %76 : vector<16x16xf32>
    %cst_38 = arith.constant dense<0.000000e+00> : vector<16xf32>
    %78 = vector.multi_reduction <add>, %77, %cst_38 [1] : vector<16x16xf32> to vector<16xf32>
    %79 = vector.shape_cast %78 : vector<16xf32> to vector<16x1xf32>
    %80 = tpu.reciprocal %79 {approx = true} : vector<16x1xf32> -> vector<16x1xf32>
    %81 = vector.broadcast %80 : vector<16x1xf32> to vector<16x16xf32>
    %82 = arith.mulf %77, %81 : vector<16x16xf32>
    %83 = vector.extract_strided_slice %28 {offsets = [0, 16], sizes = [16, 8], strides = [1, 1]} : vector<16x32xf32> to vector<16x8xf32>
    %cst_39 = arith.constant dense<0.000000e+00> : vector<16x8xf32>
    %84 = tpu.matmul %82, %83, %cst_39 {dimension_numbers = #tpu.dot_dimension_numbers<[1], [0], [0], [1], [0, 0, 1, 1], [], []>} : vector<16x16xf32>, vector<16x8xf32>, vector<16x8xf32> -> vector<16x8xf32>
    %85 = vector.extract_strided_slice %21 {offsets = [0, 16], sizes = [32, 8], strides = [1, 1]} : vector<32x32xf32> to vector<32x8xf32>
    %cst_40 = arith.constant dense<0.000000e+00> : vector<16x32xf32>
    %86 = tpu.matmul %84, %85, %cst_40 {dimension_numbers = #tpu.dot_dimension_numbers<[1], [1], [0], [0], [0, 0, 1, 0], [], []>} : vector<16x8xf32>, vector<32x8xf32>, vector<16x32xf32> -> vector<16x32xf32>
    %87 = arith.addf %67, %86 : vector<16x32xf32>
    %88 = vector.extract_strided_slice %26 {offsets = [0, 24], sizes = [16, 8], strides = [1, 1]} : vector<16x32xf32> to vector<16x8xf32>
    %89 = vector.extract_strided_slice %27 {offsets = [0, 24], sizes = [16, 8], strides = [1, 1]} : vector<16x32xf32> to vector<16x8xf32>
    %cst_41 = arith.constant dense<0.000000e+00> : vector<16x16xf32>
    %90 = tpu.matmul %88, %89, %cst_41 {dimension_numbers = #tpu.dot_dimension_numbers<[1], [1], [0], [0], [0, 0, 1, 0], [], []>} : vector<16x8xf32>, vector<16x8xf32>, vector<16x16xf32> -> vector<16x16xf32>
    %91 = vector.broadcast %16 : vector<1x16xf32> to vector<16x16xf32>
    %92 = arith.addf %90, %91 : vector<16x16xf32>
    %cst_42 = arith.constant dense<0xFF800000> : vector<16xf32>
    %93 = vector.multi_reduction <maximumf>, %92, %cst_42 [1] : vector<16x16xf32> to vector<16xf32>
    %94 = vector.shape_cast %93 : vector<16xf32> to vector<16x1xf32>
    %95 = vector.broadcast %94 : vector<16x1xf32> to vector<16x16xf32>
    %96 = arith.subf %92, %95 : vector<16x16xf32>
    %97 = math.exp %96 : vector<16x16xf32>
    %cst_43 = arith.constant dense<0.000000e+00> : vector<16xf32>
    %98 = vector.multi_reduction <add>, %97, %cst_43 [1] : vector<16x16xf32> to vector<16xf32>
    %99 = vector.shape_cast %98 : vector<16xf32> to vector<16x1xf32>
    %100 = tpu.reciprocal %99 {approx = true} : vector<16x1xf32> -> vector<16x1xf32>
    %101 = vector.broadcast %100 : vector<16x1xf32> to vector<16x16xf32>
    %102 = arith.mulf %97, %101 : vector<16x16xf32>
    %103 = vector.extract_strided_slice %28 {offsets = [0, 24], sizes = [16, 8], strides = [1, 1]} : vector<16x32xf32> to vector<16x8xf32>
    %cst_44 = arith.constant dense<0.000000e+00> : vector<16x8xf32>
    %104 = tpu.matmul %102, %103, %cst_44 {dimension_numbers = #tpu.dot_dimension_numbers<[1], [0], [0], [1], [0, 0, 1, 1], [], []>} : vector<16x16xf32>, vector<16x8xf32>, vector<16x8xf32> -> vector<16x8xf32>
    %105 = vector.extract_strided_slice %21 {offsets = [0, 24], sizes = [32, 8], strides = [1, 1]} : vector<32x32xf32> to vector<32x8xf32>
    %cst_45 = arith.constant dense<0.000000e+00> : vector<16x32xf32>
    %106 = tpu.matmul %104, %105, %cst_45 {dimension_numbers = #tpu.dot_dimension_numbers<[1], [1], [0], [0], [0, 0, 1, 0], [], []>} : vector<16x8xf32>, vector<32x8xf32>, vector<16x32xf32> -> vector<16x32xf32>
    %107 = arith.addf %87, %106 : vector<16x32xf32>
    %108 = vector.broadcast %22 : vector<1x32xf32> to vector<16x32xf32>
    %109 = arith.addf %107, %108 : vector<16x32xf32>
    %cst_46 = arith.constant dense<0.000000e+00> : vector<1x32xf32>
    %110 = tpu.matmul %11, %109, %cst_46 {dimension_numbers = #tpu.dot_dimension_numbers<[1], [0], [0], [1], [0, 0, 1, 1], [], []>} : vector<1x16xf32>, vector<16x32xf32>, vector<1x32xf32> -> vector<1x32xf32>
    %cst_47 = arith.constant dense<0.000000e+00> : vector<1xf32>
    %111 = vector.multi_reduction <add>, %11, %cst_47 [1] : vector<1x16xf32> to vector<1xf32>
    %112 = vector.shape_cast %111 : vector<1xf32> to vector<1x1xf32>
    %113 = vector.broadcast %112 : vector<1x1xf32> to vector<1x32xf32>
    %114 = arith.divf %110, %113 : vector<1x32xf32>
    %c0_48 = arith.constant 0 : index
    %c0_49 = arith.constant 0 : index
    %c0_50 = arith.constant 0 : index
    %115 = vector.load %arg6[%c0_48, %c0_49, %c0_50] : memref<1x8x32xf32, #tpu.memory_space<vmem>>, vector<1x8x32xf32>
    %116 = vector.shape_cast %115 : vector<1x8x32xf32> to vector<8x32xf32>
    %c0_51 = arith.constant 0 : index
    %c0_52 = arith.constant 0 : index
    %117 = vector.load %arg11[%c0_51, %c0_52] : memref<96x32xf32, #tpu.memory_space<vmem>>, vector<96x32xf32>
    %c0_53 = arith.constant 0 : index
    %c0_54 = arith.constant 0 : index
    %118 = vector.load %arg12[%c0_53, %c0_54] : memref<1x96xf32, #tpu.memory_space<vmem>>, vector<1x96xf32>
    %c0_55 = arith.constant 0 : index
    %c0_56 = arith.constant 0 : index
    %119 = vector.load %arg13[%c0_55, %c0_56] : memref<32x32xf32, #tpu.memory_space<vmem>>, vector<32x32xf32>
    %c0_57 = arith.constant 0 : index
    %c0_58 = arith.constant 0 : index
    %120 = vector.load %arg14[%c0_57, %c0_58] : memref<1x32xf32, #tpu.memory_space<vmem>>, vector<1x32xf32>
    %cst_59 = arith.constant dense<0.000000e+00> : vector<8x96xf32>
    %121 = tpu.matmul %116, %117, %cst_59 {dimension_numbers = #tpu.dot_dimension_numbers<[1], [1], [0], [0], [0, 0, 1, 0], [], []>} : vector<8x32xf32>, vector<96x32xf32>, vector<8x96xf32> -> vector<8x96xf32>
    %122 = vector.broadcast %118 : vector<1x96xf32> to vector<8x96xf32>
    %123 = arith.addf %121, %122 : vector<8x96xf32>
    %124 = vector.extract_strided_slice %123 {offsets = [0, 0], sizes = [8, 32], strides = [1, 1]} : vector<8x96xf32> to vector<8x32xf32>
    %125 = vector.extract_strided_slice %123 {offsets = [0, 32], sizes = [8, 32], strides = [1, 1]} : vector<8x96xf32> to vector<8x32xf32>
    %126 = vector.extract_strided_slice %123 {offsets = [0, 64], sizes = [8, 32], strides = [1, 1]} : vector<8x96xf32> to vector<8x32xf32>
    %127 = vector.extract_strided_slice %124 {offsets = [0, 0], sizes = [8, 8], strides = [1, 1]} : vector<8x32xf32> to vector<8x8xf32>
    %128 = vector.extract_strided_slice %125 {offsets = [0, 0], sizes = [8, 8], strides = [1, 1]} : vector<8x32xf32> to vector<8x8xf32>
    %cst_60 = arith.constant dense<0.000000e+00> : vector<8x8xf32>
    %129 = tpu.matmul %127, %128, %cst_60 {dimension_numbers = #tpu.dot_dimension_numbers<[1], [1], [0], [0], [0, 0, 1, 0], [], []>} : vector<8x8xf32>, vector<8x8xf32>, vector<8x8xf32> -> vector<8x8xf32>
    %cst_61 = arith.constant dense<0xFF800000> : vector<8xf32>
    %130 = vector.multi_reduction <maximumf>, %129, %cst_61 [1] : vector<8x8xf32> to vector<8xf32>
    %131 = vector.shape_cast %130 : vector<8xf32> to vector<8x1xf32>
    %132 = vector.broadcast %131 : vector<8x1xf32> to vector<8x8xf32>
    %133 = arith.subf %129, %132 : vector<8x8xf32>
    %134 = math.exp %133 : vector<8x8xf32>
    %cst_62 = arith.constant dense<0.000000e+00> : vector<8xf32>
    %135 = vector.multi_reduction <add>, %134, %cst_62 [1] : vector<8x8xf32> to vector<8xf32>
    %136 = vector.shape_cast %135 : vector<8xf32> to vector<8x1xf32>
    %137 = tpu.reciprocal %136 {approx = true} : vector<8x1xf32> -> vector<8x1xf32>
    %138 = vector.broadcast %137 : vector<8x1xf32> to vector<8x8xf32>
    %139 = arith.mulf %134, %138 : vector<8x8xf32>
    %140 = vector.extract_strided_slice %126 {offsets = [0, 0], sizes = [8, 8], strides = [1, 1]} : vector<8x32xf32> to vector<8x8xf32>
    %cst_63 = arith.constant dense<0.000000e+00> : vector<8x8xf32>
    %141 = tpu.matmul %139, %140, %cst_63 {dimension_numbers = #tpu.dot_dimension_numbers<[1], [0], [0], [1], [0, 0, 1, 1], [], []>} : vector<8x8xf32>, vector<8x8xf32>, vector<8x8xf32> -> vector<8x8xf32>
    %142 = vector.extract_strided_slice %119 {offsets = [0, 0], sizes = [32, 8], strides = [1, 1]} : vector<32x32xf32> to vector<32x8xf32>
    %cst_64 = arith.constant dense<0.000000e+00> : vector<8x32xf32>
    %143 = tpu.matmul %141, %142, %cst_64 {dimension_numbers = #tpu.dot_dimension_numbers<[1], [1], [0], [0], [0, 0, 1, 0], [], []>} : vector<8x8xf32>, vector<32x8xf32>, vector<8x32xf32> -> vector<8x32xf32>
    %144 = vector.extract_strided_slice %124 {offsets = [0, 8], sizes = [8, 8], strides = [1, 1]} : vector<8x32xf32> to vector<8x8xf32>
    %145 = vector.extract_strided_slice %125 {offsets = [0, 8], sizes = [8, 8], strides = [1, 1]} : vector<8x32xf32> to vector<8x8xf32>
    %cst_65 = arith.constant dense<0.000000e+00> : vector<8x8xf32>
    %146 = tpu.matmul %144, %145, %cst_65 {dimension_numbers = #tpu.dot_dimension_numbers<[1], [1], [0], [0], [0, 0, 1, 0], [], []>} : vector<8x8xf32>, vector<8x8xf32>, vector<8x8xf32> -> vector<8x8xf32>
    %cst_66 = arith.constant dense<0xFF800000> : vector<8xf32>
    %147 = vector.multi_reduction <maximumf>, %146, %cst_66 [1] : vector<8x8xf32> to vector<8xf32>
    %148 = vector.shape_cast %147 : vector<8xf32> to vector<8x1xf32>
    %149 = vector.broadcast %148 : vector<8x1xf32> to vector<8x8xf32>
    %150 = arith.subf %146, %149 : vector<8x8xf32>
    %151 = math.exp %150 : vector<8x8xf32>
    %cst_67 = arith.constant dense<0.000000e+00> : vector<8xf32>
    %152 = vector.multi_reduction <add>, %151, %cst_67 [1] : vector<8x8xf32> to vector<8xf32>
    %153 = vector.shape_cast %152 : vector<8xf32> to vector<8x1xf32>
    %154 = tpu.reciprocal %153 {approx = true} : vector<8x1xf32> -> vector<8x1xf32>
    %155 = vector.broadcast %154 : vector<8x1xf32> to vector<8x8xf32>
    %156 = arith.mulf %151, %155 : vector<8x8xf32>
    %157 = vector.extract_strided_slice %126 {offsets = [0, 8], sizes = [8, 8], strides = [1, 1]} : vector<8x32xf32> to vector<8x8xf32>
    %cst_68 = arith.constant dense<0.000000e+00> : vector<8x8xf32>
    %158 = tpu.matmul %156, %157, %cst_68 {dimension_numbers = #tpu.dot_dimension_numbers<[1], [0], [0], [1], [0, 0, 1, 1], [], []>} : vector<8x8xf32>, vector<8x8xf32>, vector<8x8xf32> -> vector<8x8xf32>
    %159 = vector.extract_strided_slice %119 {offsets = [0, 8], sizes = [32, 8], strides = [1, 1]} : vector<32x32xf32> to vector<32x8xf32>
    %cst_69 = arith.constant dense<0.000000e+00> : vector<8x32xf32>
    %160 = tpu.matmul %158, %159, %cst_69 {dimension_numbers = #tpu.dot_dimension_numbers<[1], [1], [0], [0], [0, 0, 1, 0], [], []>} : vector<8x8xf32>, vector<32x8xf32>, vector<8x32xf32> -> vector<8x32xf32>
    %161 = arith.addf %143, %160 : vector<8x32xf32>
    %162 = vector.extract_strided_slice %124 {offsets = [0, 16], sizes = [8, 8], strides = [1, 1]} : vector<8x32xf32> to vector<8x8xf32>
    %163 = vector.extract_strided_slice %125 {offsets = [0, 16], sizes = [8, 8], strides = [1, 1]} : vector<8x32xf32> to vector<8x8xf32>
    %cst_70 = arith.constant dense<0.000000e+00> : vector<8x8xf32>
    %164 = tpu.matmul %162, %163, %cst_70 {dimension_numbers = #tpu.dot_dimension_numbers<[1], [1], [0], [0], [0, 0, 1, 0], [], []>} : vector<8x8xf32>, vector<8x8xf32>, vector<8x8xf32> -> vector<8x8xf32>
    %cst_71 = arith.constant dense<0xFF800000> : vector<8xf32>
    %165 = vector.multi_reduction <maximumf>, %164, %cst_71 [1] : vector<8x8xf32> to vector<8xf32>
    %166 = vector.shape_cast %165 : vector<8xf32> to vector<8x1xf32>
    %167 = vector.broadcast %166 : vector<8x1xf32> to vector<8x8xf32>
    %168 = arith.subf %164, %167 : vector<8x8xf32>
    %169 = math.exp %168 : vector<8x8xf32>
    %cst_72 = arith.constant dense<0.000000e+00> : vector<8xf32>
    %170 = vector.multi_reduction <add>, %169, %cst_72 [1] : vector<8x8xf32> to vector<8xf32>
    %171 = vector.shape_cast %170 : vector<8xf32> to vector<8x1xf32>
    %172 = tpu.reciprocal %171 {approx = true} : vector<8x1xf32> -> vector<8x1xf32>
    %173 = vector.broadcast %172 : vector<8x1xf32> to vector<8x8xf32>
    %174 = arith.mulf %169, %173 : vector<8x8xf32>
    %175 = vector.extract_strided_slice %126 {offsets = [0, 16], sizes = [8, 8], strides = [1, 1]} : vector<8x32xf32> to vector<8x8xf32>
    %cst_73 = arith.constant dense<0.000000e+00> : vector<8x8xf32>
    %176 = tpu.matmul %174, %175, %cst_73 {dimension_numbers = #tpu.dot_dimension_numbers<[1], [0], [0], [1], [0, 0, 1, 1], [], []>} : vector<8x8xf32>, vector<8x8xf32>, vector<8x8xf32> -> vector<8x8xf32>
    %177 = vector.extract_strided_slice %119 {offsets = [0, 16], sizes = [32, 8], strides = [1, 1]} : vector<32x32xf32> to vector<32x8xf32>
    %cst_74 = arith.constant dense<0.000000e+00> : vector<8x32xf32>
    %178 = tpu.matmul %176, %177, %cst_74 {dimension_numbers = #tpu.dot_dimension_numbers<[1], [1], [0], [0], [0, 0, 1, 0], [], []>} : vector<8x8xf32>, vector<32x8xf32>, vector<8x32xf32> -> vector<8x32xf32>
    %179 = arith.addf %161, %178 : vector<8x32xf32>
    %180 = vector.extract_strided_slice %124 {offsets = [0, 24], sizes = [8, 8], strides = [1, 1]} : vector<8x32xf32> to vector<8x8xf32>
    %181 = vector.extract_strided_slice %125 {offsets = [0, 24], sizes = [8, 8], strides = [1, 1]} : vector<8x32xf32> to vector<8x8xf32>
    %cst_75 = arith.constant dense<0.000000e+00> : vector<8x8xf32>
    %182 = tpu.matmul %180, %181, %cst_75 {dimension_numbers = #tpu.dot_dimension_numbers<[1], [1], [0], [0], [0, 0, 1, 0], [], []>} : vector<8x8xf32>, vector<8x8xf32>, vector<8x8xf32> -> vector<8x8xf32>
    %cst_76 = arith.constant dense<0xFF800000> : vector<8xf32>
    %183 = vector.multi_reduction <maximumf>, %182, %cst_76 [1] : vector<8x8xf32> to vector<8xf32>
    %184 = vector.shape_cast %183 : vector<8xf32> to vector<8x1xf32>
    %185 = vector.broadcast %184 : vector<8x1xf32> to vector<8x8xf32>
    %186 = arith.subf %182, %185 : vector<8x8xf32>
    %187 = math.exp %186 : vector<8x8xf32>
    %cst_77 = arith.constant dense<0.000000e+00> : vector<8xf32>
    %188 = vector.multi_reduction <add>, %187, %cst_77 [1] : vector<8x8xf32> to vector<8xf32>
    %189 = vector.shape_cast %188 : vector<8xf32> to vector<8x1xf32>
    %190 = tpu.reciprocal %189 {approx = true} : vector<8x1xf32> -> vector<8x1xf32>
    %191 = vector.broadcast %190 : vector<8x1xf32> to vector<8x8xf32>
    %192 = arith.mulf %187, %191 : vector<8x8xf32>
    %193 = vector.extract_strided_slice %126 {offsets = [0, 24], sizes = [8, 8], strides = [1, 1]} : vector<8x32xf32> to vector<8x8xf32>
    %cst_78 = arith.constant dense<0.000000e+00> : vector<8x8xf32>
    %194 = tpu.matmul %192, %193, %cst_78 {dimension_numbers = #tpu.dot_dimension_numbers<[1], [0], [0], [1], [0, 0, 1, 1], [], []>} : vector<8x8xf32>, vector<8x8xf32>, vector<8x8xf32> -> vector<8x8xf32>
    %195 = vector.extract_strided_slice %119 {offsets = [0, 24], sizes = [32, 8], strides = [1, 1]} : vector<32x32xf32> to vector<32x8xf32>
    %cst_79 = arith.constant dense<0.000000e+00> : vector<8x32xf32>
    %196 = tpu.matmul %194, %195, %cst_79 {dimension_numbers = #tpu.dot_dimension_numbers<[1], [1], [0], [0], [0, 0, 1, 0], [], []>} : vector<8x8xf32>, vector<32x8xf32>, vector<8x32xf32> -> vector<8x32xf32>
    %197 = arith.addf %179, %196 : vector<8x32xf32>
    %198 = vector.broadcast %120 : vector<1x32xf32> to vector<8x32xf32>
    %199 = arith.addf %197, %198 : vector<8x32xf32>
    %cst_80 = arith.constant dense<0.000000e+00> : vector<32xf32>
    %200 = vector.multi_reduction <add>, %199, %cst_80 [0] : vector<8x32xf32> to vector<32xf32>
    %201 = vector.shape_cast %200 : vector<32xf32> to vector<1x32xf32>
    %cst_81 = arith.constant 1.250000e-01 : f32
    %202 = vector.broadcast %cst_81 : f32 to vector<1x32xf32>
    %203 = arith.mulf %201, %202 : vector<1x32xf32>
    %c0_82 = arith.constant 0 : index
    %c0_83 = arith.constant 0 : index
    %204 = vector.load %arg16[%c0_82, %c0_83] : memref<32x32xf32, #tpu.memory_space<vmem>>, vector<32x32xf32>
    %cst_84 = arith.constant dense<0.000000e+00> : vector<1x32xf32>
    %205 = tpu.matmul %114, %204, %cst_84 {dimension_numbers = #tpu.dot_dimension_numbers<[1], [1], [0], [0], [0, 0, 1, 0], [], []>} : vector<1x32xf32>, vector<32x32xf32>, vector<1x32xf32> -> vector<1x32xf32>
    %c0_85 = arith.constant 0 : index
    %c0_86 = arith.constant 0 : index
    %206 = vector.load %arg17[%c0_85, %c0_86] : memref<32x32xf32, #tpu.memory_space<vmem>>, vector<32x32xf32>
    %cst_87 = arith.constant dense<0.000000e+00> : vector<1x32xf32>
    %207 = tpu.matmul %203, %206, %cst_87 {dimension_numbers = #tpu.dot_dimension_numbers<[1], [1], [0], [0], [0, 0, 1, 0], [], []>} : vector<1x32xf32>, vector<32x32xf32>, vector<1x32xf32> -> vector<1x32xf32>
    %208 = arith.addf %205, %207 : vector<1x32xf32>
    %c0_88 = arith.constant 0 : index
    %c0_89 = arith.constant 0 : index
    %209 = vector.load %arg18[%c0_88, %c0_89] : memref<1x32xf32, #tpu.memory_space<vmem>>, vector<1x32xf32>
    %210 = arith.addf %208, %209 : vector<1x32xf32>
    %c0_90 = arith.constant 0 : index
    %c0_91 = arith.constant 0 : index
    %211 = vector.load %arg15[%c0_90, %c0_91] : memref<32x32xf32, #tpu.memory_space<vmem>>, vector<32x32xf32>
    %cst_92 = arith.constant dense<0.000000e+00> : vector<4x32xf32>
    %212 = tpu.matmul %9, %211, %cst_92 {dimension_numbers = #tpu.dot_dimension_numbers<[1], [1], [0], [0], [0, 0, 1, 0], [], []>} : vector<4x32xf32>, vector<32x32xf32>, vector<4x32xf32> -> vector<4x32xf32>
    %213 = vector.broadcast %210 : vector<1x32xf32> to vector<4x32xf32>
    %214 = arith.addf %212, %213 : vector<4x32xf32>
    %cst_93 = arith.constant 0.000000e+00 : f32
    %215 = vector.broadcast %cst_93 : f32 to vector<4x32xf32>
    %216 = arith.maximumf %214, %215 : vector<4x32xf32>
    %c0_94 = arith.constant 0 : index
    %c0_95 = arith.constant 0 : index
    %217 = vector.load %arg19[%c0_94, %c0_95] : memref<1x32xf32, #tpu.memory_space<vmem>>, vector<1x32xf32>
    %cst_96 = arith.constant dense<0.000000e+00> : vector<1x4xf32>
    %218 = tpu.matmul %217, %216, %cst_96 {dimension_numbers = #tpu.dot_dimension_numbers<[1], [1], [0], [0], [0, 0, 1, 0], [], []>} : vector<1x32xf32>, vector<4x32xf32>, vector<1x4xf32> -> vector<1x4xf32>
    %c0_97 = arith.constant 0 : index
    %c0_98 = arith.constant 0 : index
    %c0_99 = arith.constant 0 : index
    %219 = vector.load %arg3[%c0_97, %c0_98, %c0_99] : memref<1x1x4xf32, #tpu.memory_space<vmem>>, vector<1x1x4xf32>
    %220 = vector.shape_cast %219 : vector<1x1x4xf32> to vector<1x4xf32>
    %221 = arith.mulf %220, %218 : vector<1x4xf32>
    %c0_100 = arith.constant 0 : index
    %c0_101 = arith.constant 0 : index
    %222 = vector.load %arg20[%c0_100, %c0_101] : memref<1x1xf32, #tpu.memory_space<vmem>>, vector<1x1xf32>
    %223 = vector.broadcast %222 : vector<1x1xf32> to vector<1x4xf32>
    %224 = arith.addf %221, %223 : vector<1x4xf32>
    %225 = arith.mulf %220, %224 : vector<1x4xf32>
    %c0_102 = arith.constant 0 : index
    %c0_103 = arith.constant 0 : index
    %c0_104 = arith.constant 0 : index
    %226 = vector.load %arg21[%c0_102, %c0_103, %c0_104] : memref<1x1x4xf32, #tpu.memory_space<vmem>>, vector<1x1x4xf32>
    %227 = vector.shape_cast %226 : vector<1x1x4xf32> to vector<1x4xf32>
    %228 = vector.shape_cast %225 : vector<1x4xf32> to vector<1x1x4xf32>
    tpu.vector_store %arg21[%c0_102, %c0_103, %c0_104], %228 {strides = array<i32>} : memref<1x1x4xf32, #tpu.memory_space<vmem>>, vector<1x1x4xf32>,
    return
  }
  func.func @transform_0(%arg0: i32) -> (i32, i32, i32, i32) {
    %c0_i32 = arith.constant 0 : i32
    %c0_i32_0 = arith.constant 0 : i32
    %c0_i32_1 = arith.constant 0 : i32
    %c0_i32_2 = arith.constant 0 : i32
    return %arg0, %c0_i32, %c0_i32_0, %c0_i32_1 : i32, i32, i32, i32
  }
  func.func @transform_1(%arg0: i32) -> (i32, i32, i32, i32) {
    %c0_i32 = arith.constant 0 : i32
    %c0_i32_0 = arith.constant 0 : i32
    %c0_i32_1 = arith.constant 0 : i32
    %c0_i32_2 = arith.constant 0 : i32
    return %arg0, %c0_i32, %c0_i32_0, %c0_i32_1 : i32, i32, i32, i32
  }
  func.func @transform_2(%arg0: i32) -> (i32, i32, i32) {
    %c0_i32 = arith.constant 0 : i32
    %c0_i32_0 = arith.constant 0 : i32
    %c0_i32_1 = arith.constant 0 : i32
    return %arg0, %c0_i32, %c0_i32_0 : i32, i32, i32
  }
  func.func @transform_3(%arg0: i32) -> (i32, i32, i32) {
    %c0_i32 = arith.constant 0 : i32
    %c0_i32_0 = arith.constant 0 : i32
    %c0_i32_1 = arith.constant 0 : i32
    return %arg0, %c0_i32, %c0_i32_0 : i32, i32, i32
  }
  func.func @transform_4(%arg0: i32) -> (i32, i32, i32) {
    %c0_i32 = arith.constant 0 : i32
    %c0_i32_0 = arith.constant 0 : i32
    %c0_i32_1 = arith.constant 0 : i32
    return %arg0, %c0_i32, %c0_i32_0 : i32, i32, i32
  }
  func.func @transform_5(%arg0: i32) -> (i32, i32, i32) {
    %c0_i32 = arith.constant 0 : i32
    %c0_i32_0 = arith.constant 0 : i32
    %c0_i32_1 = arith.constant 0 : i32
    return %arg0, %c0_i32, %c0_i32_0 : i32, i32, i32
  }
  func.func @transform_6(%arg0: i32) -> (i32, i32) {
    %c0_i32 = arith.constant 0 : i32
    %c0_i32_0 = arith.constant 0 : i32
    %c0_i32_1 = arith.constant 0 : i32
    return %c0_i32, %c0_i32_0 : i32, i32
  }
  func.func @transform_7(%arg0: i32) -> (i32, i32) {
    %c0_i32 = arith.constant 0 : i32
    %c0_i32_0 = arith.constant 0 : i32
    %c0_i32_1 = arith.constant 0 : i32
    return %c0_i32, %c0_i32_0 : i32, i32
  }
  func.func @transform_8(%arg0: i32) -> (i32, i32) {
    %c0_i32 = arith.constant 0 : i32
    %c0_i32_0 = arith.constant 0 : i32
    %c0_i32_1 = arith.constant 0 : i32
    return %c0_i32, %c0_i32_0 : i32, i32
  }
  func.func @transform_9(%arg0: i32) -> (i32, i32) {
    %c0_i32 = arith.constant 0 : i32
    %c0_i32_0 = arith.constant 0 : i32
    %c0_i32_1 = arith.constant 0 : i32
    return %c0_i32, %c0_i32_0 : i32, i32
  }
  func.func @transform_10(%arg0: i32) -> (i32, i32) {
    %c0_i32 = arith.constant 0 : i32
    %c0_i32_0 = arith.constant 0 : i32
    %c0_i32_1 = arith.constant 0 : i32
    return %c0_i32, %c0_i32_0 : i32, i32
  }
  func.func @transform_11(%arg0: i32) -> (i32, i32) {
    %c0_i32 = arith.constant 0 : i32
    %c0_i32_0 = arith.constant 0 : i32
    %c0_i32_1 = arith.constant 0 : i32
    return %c0_i32, %c0_i32_0 : i32, i32
  }
  func.func @transform_12(%arg0: i32) -> (i32, i32) {
    %c0_i32 = arith.constant 0 : i32
    %c0_i32_0 = arith.constant 0 : i32
    %c0_i32_1 = arith.constant 0 : i32
    return %c0_i32, %c0_i32_0 : i32, i32
  }
  func.func @transform_13(%arg0: i32) -> (i32, i32) {
    %c0_i32 = arith.constant 0 : i32
    %c0_i32_0 = arith.constant 0 : i32
    %c0_i32_1 = arith.constant 0 : i32
    return %c0_i32, %c0_i32_0 : i32, i32
  }
  func.func @transform_14(%arg0: i32) -> (i32, i32) {
    %c0_i32 = arith.constant 0 : i32
    %c0_i32_0 = arith.constant 0 : i32
    %c0_i32_1 = arith.constant 0 : i32
    return %c0_i32, %c0_i32_0 : i32, i32
  }
  func.func @transform_15(%arg0: i32) -> (i32, i32) {
    %c0_i32 = arith.constant 0 : i32
    %c0_i32_0 = arith.constant 0 : i32
    %c0_i32_1 = arith.constant 0 : i32
    return %c0_i32, %c0_i32_0 : i32, i32
  }
  func.func @transform_16(%arg0: i32) -> (i32, i32) {
    %c0_i32 = arith.constant 0 : i32
    %c0_i32_0 = arith.constant 0 : i32
    %c0_i32_1 = arith.constant 0 : i32
    return %c0_i32, %c0_i32_0 : i32, i32
  }
  func.func @transform_17(%arg0: i32) -> (i32, i32) {
    %c0_i32 = arith.constant 0 : i32
    %c0_i32_0 = arith.constant 0 : i32
    %c0_i32_1 = arith.constant 0 : i32
    return %c0_i32, %c0_i32_0 : i32, i32
  }
  func.func @transform_18(%arg0: i32) -> (i32, i32) {
    %c0_i32 = arith.constant 0 : i32
    %c0_i32_0 = arith.constant 0 : i32
    %c0_i32_1 = arith.constant 0 : i32
    return %c0_i32, %c0_i32_0 : i32, i32
  }
  func.func @transform_19(%arg0: i32) -> (i32, i32) {
    %c0_i32 = arith.constant 0 : i32
    %c0_i32_0 = arith.constant 0 : i32
    %c0_i32_1 = arith.constant 0 : i32
    return %c0_i32, %c0_i32_0 : i32, i32
  }
  func.func @transform_20(%arg0: i32) -> (i32, i32, i32) {
    %c0_i32 = arith.constant 0 : i32
    %c0_i32_0 = arith.constant 0 : i32
    %c0_i32_1 = arith.constant 0 : i32
    return %arg0, %c0_i32, %c0_i32_0 : i32, i32, i32
  }
}

</mosaic_0001>

<bundles_post_ra>
// kernel: tpu_custom_call.1
= control target key start
LH: loop header
LB: loop body
LE: loop exit
PB: predicated region body
PF: predicated region fallthrough
CT: control target
= control target key end

     0   :  { %s3662_s0 = inlined_call_operand.vmem [shape: f32[2,4,8,32], index: 0, kind: input, shape index: {}]   ;;  %s3663_s1 = inlined_call_operand.vmem [shape: f32[2,4,8,1], index: 1, kind: input, shape index: {}]   ;;  %s3664_s2 = inlined_call_operand.vmem [shape: f32[2,1,4], index: 2, kind: input, shape index: {}]   ;;  %s3665_s3 = inlined_call_operand.vmem [shape: f32[2,16,32], index: 3, kind: input, shape index: {}]   ;;  %s3666_s4 = inlined_call_operand.vmem [shape: f32[2,1,16], index: 4, kind: input, shape index: {}]   ;;  %s3667_s5 = inlined_call_operand.hbm [shape: f32[2,8,32], index: 5, kind: input, shape index: {}]   ;;  %s3668_s6 = inlined_call_operand.vmem [shape: f32[96,32], index: 6, kind: input, shape index: {}]   ;;  %s3669_s7 = inlined_call_operand.vmem [shape: f32[1,96], index: 7, kind: input, shape index: {}]   ;;  %s3670_s8 = inlined_call_operand.vmem [shape: f32[32,32], index: 8, kind: input, shape index: {}]   ;;  %s3671_s9 = inlined_call_operand.vmem [shape: f32[1,32], index: 9, kind: input, shape index: {}]   ;;  %s3672_s10 = inlined_call_operand.vmem [shape: f32[96,32], index: 10, kind: input, shape index: {}]   ;;  %s3673_s11 = inlined_call_operand.vmem [shape: f32[1,96], index: 11, kind: input, shape index: {}]   ;;  %s3674_s12 = inlined_call_operand.vmem [shape: f32[32,32], index: 12, kind: input, shape index: {}]   ;;  %s3675_s13 = inlined_call_operand.vmem [shape: f32[1,32], index: 13, kind: input, shape index: {}]   ;;  %s3676_s14 = inlined_call_operand.vmem [shape: f32[32,32], index: 14, kind: input, shape index: {}]   ;;  %s3677_s15 = inlined_call_operand.vmem [shape: f32[32,32], index: 15, kind: input, shape index: {}]   ;;  %s3678_s16 = inlined_call_operand.vmem [shape: f32[32,32], index: 16, kind: input, shape index: {}]   ;;  %s3679_s17 = inlined_call_operand.vmem [shape: f32[1,32], index: 17, kind: input, shape index: {}]   ;;  %s3680_s18 = inlined_call_operand.vmem [shape: f32[1,32], index: 18, kind: input, shape index: {}]   ;;  %s3681_s19 = inlined_call_operand.<no memory space> [shape: f32[1,1], index: 19, kind: input, shape index: {}]   ;;  %s3682_s20 = inlined_call_operand.hbm [shape: f32[2,1,4], index: 20, kind: output, shape index: {}]  }
   0x1   :  { %3697 = sst [smem:[#allocation15_spill]] %s3662_s0  ;;  %v25_v0 = vstv %s3681_s19 }
   0x2   :  { %3698 = sst [smem:[#allocation16_spill]] %s3663_s1  ;;  %26 = vst [vmem:[#allocation2] sm:$0x1] %v25_v0 }
   0x3   :  { %3699 = sst [smem:[#allocation17_spill]] %s3664_s2 }
   0x4   :  { %3700 = sst [smem:[#allocation18_spill]] %s3665_s3 }
   0x5   :  { %3701 = sst [smem:[#allocation19_spill]] %s3666_s4 }
   0x6   :  { %3702 = sst [smem:[#allocation20_spill]] %s3680_s18 }
   0x7   :  { %3703 = sst [smem:[#allocation21_spill]] %s3682_s20 }
   0x8   :  { %27 = vsyncpa [#allocation4], 0 }
   0x9   :  { %29 = vsyncpa [#allocation4 + $0x1], 0 }
   0xa   :  { %30 = vsyncpa [#allocation5], 0 }
   0xb   :  { %32 = vsyncpa [#allocation5 + $0x1], 0  ;;  %s2926_s23 = smov 0   ;;  %s2928_s24 = smov 0  }
   0xc   :  { %s2930_s2 = smov 0   ;;  %s2932_s25 = smov 0  }
   0xd LB: > { %3704 = sst [smem:[#allocation9_spill]] %s2791_s23  ;;  %s2947_s19 = sadd.s32 4294967295, %s2803_s25   ;;  %s2803_s25 = sphi %s2932_s25, %s3744_s25   ;;  %s2799_s2 = sphi %s2930_s2, %s3749_s2   ;;  %s2795_s24 = sphi %s2928_s24, %s3748_s24   ;;  %s2791_s23 = sphi %s2926_s23, %s3747_s23  }
   0xe   : > { %3705 = sst [smem:[#allocation10_spill]] %s2799_s2  ;;  %s2420_s3 = sadd.s32 4294967294, %s2803_s25  }
   0xf   : > { %s2951_s26 = sadd.s32 1, %s2803_s25   ;;  %s175_s27 = sadd.s32 1, %s2799_s2 }
  0x10   : > { %3706 = sst [smem:[#allocation11_spill]] %s2951_s26  ;;  %s172_s28 = ssub.s32 %s2803_s25, %s2951_s26 }
  0x11   : > { %p182_p0 = scmp.ne.s32.totalorder %s2799_s2, %s2795_s24  ;;  %p173_p1 = scmp.eq.s32.totalorder %s172_s28, 0 }
  0x12   : > { %p183_p2 = scmp.eq.s32.totalorder %s2803_s25, 0  ;;  %p188_p3 = scmp.ne.s32.totalorder %s2795_s24, %s2791_s23 }
  0x13   : > { %p189_p4 = scmp.eq.s32.totalorder %s2947_s19, 0  ;;  %p506_p7 = scmp.eq.s32.totalorder %s2947_s19, 1 }
  0x14   : > { %s2963_s4 = scalar_select %p173_p1, %s2799_s2, %s175_s27  }
  0x15   : > { %p2965_p5 = por %p183_p2, %p182_p0  ;;  %p2969_p6 = por %p189_p4, %p188_p3 }
  0x16   : > { %3707 = sst [smem:[#allocation12_spill]] %s2963_s4  ;;  %p512_p8 = scmp.eq.s32.totalorder %s2420_s3, 1 }
  0x17   : > { %p2575_p10 = scmp.lt.s32.totalorder %s2803_s25, 2  ;;  %p2976_p11 = por %p506_p7, %p182_p0 }
  0x18   : > { %p2980_p12 = por %p512_p8, %p188_p3  ;;  %s610_s1 = sand.u32 1, %s2799_s2  }
  0x19   : > { %s3710_s0 = scalar_select %p2976_p11, 1, 0 }
  0x1a   : > { %s3712_s21 = scalar_select %p2980_p12, 1, 0 }
  0x1b   : > { %3711 = sst [smem:[#allocation13_spill]] %s3710_s0  ;;  %s2424_s22 = sshll.u32 %s2803_s25, 3 }
  0x1c   : > { %3713 = sst [smem:[#allocation14_spill]] %s3712_s21  ;;  %s2423_s27 = sshll.u32 %s610_s1, 3 }
  0x1d   : > { %s618_s26 = scalar_lea.hbm %s3667_s5, %s2424_s22  ;;  %s614_s3 = scalar_lea.vmem [#allocation3], %s2423_s27 }
  0x1e   : > { %s620_s23 = sshll.u32 %s618_s26, 4  ;;  %s622_s20 = sshll.u32 %s614_s3, 4  ;;  %s621_s23 = int_to_ptr.hbm [resolvable:$true] %s620_s23  ;;  %s623_s20 = int_to_ptr.vmem [resolvable:$true] %s622_s20 }
  0x1f   : > { %p2991_p13 = pnand %p2575_p10, %p2965_p5  ;;  %p2425_p0 = scmp.ge.s32.totalorder %s2803_s25, 1 }
  0x20   : > { %p627_p1 = scmp.lt.s32.totalorder %s2803_s25, 3  ;;  %s611_s2 = scalar_lea.sflag [#allocation4], %s610_s1 }
  0x21   : > { %s2707_s21 = sshra.s32 %s621_s23, 4  ;;  %p2711_p3 = pneg %p2991_p13  ;;  %s2708_s21 = int_to_ptr.hbm [resolvable:$true] %s2707_s21 }
  0x22   : > { %s2709_s0 = scalar_lea.hbm %s2708_s21, 8  ;;  %s2714_s29 = scalar_lea.hbm %s3667_s5, 16 }
  0x23   : > { %p2710_p2 = scmp.ne.s32.totalorder %s2708_s21, %s2709_s0  ;;  %p2715_p5 = scmp.lt.s32.totalorder %s2708_s21, %s3667_s5 }
  0x24   : > { %p2716_p8 = scmp.lt.s32.totalorder %s2714_s29, %s2709_s0 }
  0x25   : > { %p2712_p4 = pnand %p2711_p3, %p2710_p2 }
  0x26   : > { %p2717_p10 = por %p2716_p8, %p2715_p5 }
  0x27   : > { %p2713_p7 = pneg %p2712_p4 }
  0x29   : > { %p2718_p9 = pnand %p2717_p10, %p2713_p7 }
  0x2b   : > { %2721 = shalt.err (!%p2718_p9)
}
  0x2c   : > { %2570 = dma.hbm_to_vmem [thread:$0]  (!%p2991_p13), %s621_s23, 128, %s623_s20, %s611_s2  }
  0x2d   : > { %p628_p2 = pnand %p2425_p0, %p627_p1 }
  0x2e   : > { %s3012_s1 = sand.u32 (!%p628_p2), 1, %s2795_s24  }
  0x2f   : > { %631 = sbr.rel (%p628_p2) target bundleno = 2971 (0xb9b), region = 100  ;;  %s2426_s21 = sshll.u32 (!%p628_p2), %s3012_s1, 3 }
  0x30   : > { %s634_s0 = scalar_lea.sflag (!%p628_p2), [#allocation4], %s3012_s1  ;;  %s3016_s28 = scalar_lea.vmem (!%p628_p2), [#allocation3], %s2426_s21 }
  0x34   : > { %2782 = dma.done.wait (%p2969_p6), %s634_s0, 128  }
  0x35   : > { %2784 = vsyncadd (%p2969_p6), %s634_s0, 4294967168  ;;  %vm768_vm0 = vcmask 261120   ;;  %v922_v1 = vld [vmem:[%s3668_s6 + $0x58] sm:$0xff]  ;;  %v921_v2 = vld [vmem:[%s3668_s6 + $0x50] sm:$0xff]  ;;  %p715_p6 = scmp.lt.s32.totalorder %s2947_s19, 1  ;;  %s3715_s23 = sld [smem:[#allocation18_spill]] }
  0x36   : > { %2433 = vmatpush.xpose.msk.msra.mxu0 %vm768_vm0, %v922_v1  ;;  %v920_v3 = vld [vmem:[%s3668_s6 + $0x48] sm:$0xff]  ;;  %v919_v4 = vld [vmem:[%s3668_s6 + $0x40] sm:$0xff]  ;;  %v918_v5 = vld [vmem:[%s3668_s6 + $0x38] sm:$0xff]  ;;  %s2805_s30 = smov 120   ;;  %s2806_s29 = smov 88   ;;  %vm1006_vm1 = vcmask 64512  }
  0x37   : > { %v917_v6 = vld [vmem:[%s3668_s6 + $0x30] sm:$0xff]  ;;  %v916_v7 = vld [vmem:[%s3668_s6 + $0x28] sm:$0xff]  ;;  %v915_v8 = vld [vmem:[%s3668_s6 + $0x20] sm:$0xff]  ;;  %s3063_s4 = scalar_select %p715_p6, %s2947_s19, 1  ;;  %v2808_v27 = vmov -1e+30  }
  0x38   : > { %v914_v9 = vld [vmem:[%s3668_s6 + $0x18] sm:$0xff]  ;;  %v913_v10 = vld [vmem:[%s3668_s6 + $0x10] sm:$0xff]  ;;  %v912_v11 = vld [vmem:[%s3668_s6 + $0x8] sm:$0xff]  ;;  %s3696_s22 = smov 96   ;;  %s3716_s0 = sld [smem:[#allocation19_spill]]  ;;  %vm1038_vm3 = vcmask 130048  }
  0x39   : > { %s2562_s27 = sshll.u32 %s3063_s4, 4  ;;  %v911_v12 = vld [vmem:[%s3668_s6] sm:$0xff]  ;;  %s3694_s20 = smov 64   ;;  %vm1592_vm4 = vcmask 122880   ;;  %vm797_vm7 = vcmask 7168  }
  0x3a   : > { %2434 = vmatpush.xpose.msk.msra.mxu0 %vm768_vm0, %v921_v2  ;;  %v2645_v15 = vld [vmem:[%s3669_s7] ss:$0 sm:$0xff]  ;;  %s3693_s3 = smov 72   ;;  %s2813_s26 = smov 104  }
  0x3b   : > { %s732_s2 = scalar_lea.vmem %s3715_s23, %s2562_s27  ;;  %s3692_s23 = smov 80  }
  0x3c   : > { %v909_v13 = vld [vmem:[%s732_s2] sm:$0xff]  ;;  %v910_v14 = vld [vmem:[%s732_s2 + $0x8] sm:$0xff]  ;;  %s2811_s2 = smov 112   ;;  %s3691_s27 = smov 56  }
  0x3e   : > { %2435 = vmatpush.xpose.msk.msra.mxu0 %vm768_vm0, %v920_v3  ;;  %s735_s18 = scalar_lea.vmem %s3716_s0, %s3063_s4  ;;  %s3719_s0 = smov 72  }
  0x3f   : > { %v3113_v26 = vld [vmem:[%s735_s18] sm:$0x1]  ;;  %s3718_s18 = smov 64  }
  0x40   : > { %vm907_vm2 = vcmp.gt.f32.partialorder %v3113_v26, 0.0 }
  0x41   : > { %v908_v28 = vsel %vm907_vm2, 0.0, %v2808_v27 }
  0x42   : > { %2436 = vmatpush.xpose.msk.msra.mxu0 %vm768_vm0, %v919_v4  ;;  %v3116_v29 = vperm.slane %v908_v28, 0 }
  0x46   : > { %2437 = vmatpush.xpose.msk.msra.mxu0 %vm768_vm0, %v918_v5 }
  0x4a   : > { %2438 = vmatpush.xpose.msk.msra.mxu0 %vm768_vm0, %v917_v6 }
  0x4e   : > { %2439 = vmatpush.xpose.msk.msra.mxu0 %vm768_vm0, %v916_v7 }
  0x52   : > { %2440 = vmatpush.xpose.msk.msra.mxu0 %vm768_vm0, %v915_v8 }
  0x56   : > { %2441 = vmatpush.xpose.msk.msra.mxu0 %vm768_vm0, %v914_v9 }
  0x5a   : > { %2442 = vmatpush.xpose.msk.msra.mxu0 %vm768_vm0, %v913_v10 }
  0x5e   : > { %2443 = vmatpush.xpose.msk.msra.mxu0 %vm768_vm0, %v912_v11 }
  0x62   : > { %2444 = vmatpush.xpose.msk.msra.mxu0 %vm768_vm0, %v911_v12 }
  0x65   : > { %2445 = vmatmul.msk.f32.vlgmr.msra.gmra.mxu0 %vm768_vm0, %v909_v13 }
  0x6d   : > { %2446 = vmatmul.msk.f32.gmra.mxu0 %vm768_vm0, %v910_v14 }
  0xe2   : > { %v991_v16 = vpop.f32.mrf.mxu0 }
  0xe3   : > { %v3083_v17 = vadd.f32 %v2645_v15, %v991_v16 }
  0xe5   : > { %1096 = vrot.lane.b32.xlu2 %v3083_v17, %s2805_s30 }
  0xea   : > { %v994_v18 = vpop.f32.mrf.mxu0 }
  0xeb   : > { %v3087_v19 = vadd.f32 %v2645_v15, %v994_v18 }
  0xed   : > { %1102 = vrot.lane.b32.xlu1 %v3087_v19, %s2806_s29  ;;  %1004 = vrot.lane.b32.xlu0 %v3087_v19, %s3696_s22  ;;  %v3128_v42 = vpack.i.bf16 %v3083_v17, %v3087_v19 }
  0xee   : > { %1098 = vrot.lane.b32.xlu2 %v3087_v19, %s2805_s30 }
  0xf5   : > { %1100 = vrot.lane.b32.xlu1 %v3083_v17, %s2806_s29  ;;  %1002 = vrot.lane.b32.xlu0 %v3083_v17, %s3696_s22  ;;  %s2816_s22 = smov 40  }
 0x13f   : > { %v1097_v24 = vpop.permute.xlu2 %1096 }
 0x148   : > { %v1099_v25 = vpop.permute.xlu2 %1098 }
 0x15f   : > { %v1103_v20 = vpop.permute.xlu1 %1102  ;;  %v1005_v21 = vpop.permute.xlu0 %1004 }
 0x160   : > { %2447 = vmatpush.xpose.msk.msra.mxu1 %vm1006_vm1, %v1005_v21  ;;  %2453 = vmatpush.xpose.msk.msra.mxu3 %vm1006_vm1, %v1103_v20  ;;  %v3164_v21 = vld [vmem:[%s3670_s8 + $0x18] sm:$0xff] }
 0x167   : > { %v1101_v22 = vpop.permute.xlu1 %1100  ;;  %v1003_v23 = vpop.permute.xlu0 %1002 }
 0x168   : > { %2448 = vmatpush.xpose.msk.msra.mxu1 %vm1006_vm1, %v1003_v23  ;;  %2454 = vmatpush.xpose.msk.msra.mxu3 %vm1006_vm1, %v1101_v22  ;;  %v3171_v22 = vld [vmem:[%s3670_s8 + $0x10] sm:$0xff]  ;;  %v3182_v23 = vld [vmem:[%s3670_s8 + $0x8] sm:$0xff] }
 0x16b   : > { %2449 = vmatmul.msk.f32.vlgmr.msra.gmra.mxu1 %vm1006_vm1, %v3083_v17  ;;  %2455 = vmatmul.msk.f32.vlgmr.msra.gmra.mxu3 %vm1006_vm1, %v1097_v24 }
 0x16c   : > { %2465 = vmatpush.xpose.msk.msrb.mxu3 %vm1006_vm1, %v3164_v21 }
 0x170   : > { %2466 = vmatpush.xpose.msk.msrb.mxu3 %vm1006_vm1, %v3171_v22 }
 0x173   : > { %2450 = vmatmul.msk.f32.gmra.mxu1 %vm1006_vm1, %v3087_v19  ;;  %2456 = vmatmul.msk.f32.gmra.mxu3 %vm1006_vm1, %v1099_v25  ;;  %v3191_v25 = vld [vmem:[%s3670_s8] sm:$0xff] }
 0x174   : > { %2467 = vmatpush.xpose.msk.msrb.mxu3 %vm1006_vm1, %v3182_v23 }
 0x178   : > { %2468 = vmatpush.xpose.msk.msrb.mxu3 %vm1006_vm1, %v3191_v25 }
 0x1e8   : > { %v1032_v30 = vpop.f32.mrf.mxu1 }
 0x1e9   : > { %v1033_v31 = vadd.f32 %v1032_v30, %v3116_v29 }
 0x1eb   : > { %v1039_v32 = vsel %vm1038_vm3, %v1033_v31, -inf }
 0x1ec   : > { %1040 = vmax.xlane.f32.xlu0 %v1039_v32 }
 0x1ee   : > { %v1129_v33 = vpop.f32.mrf.mxu3 }
 0x1ef   : > { %v1130_v34 = vadd.f32 %v1129_v33, %v3116_v29 }
 0x1f0   : > { %v1035_v35 = vpop.f32.mrf.mxu1 }
 0x1f1   : > { %v1036_v36 = vadd.f32 %v1035_v35, %v3116_v29  ;;  %v1135_v37 = vsel %vm1038_vm3, %v1130_v34, -inf }
 0x1f2   : > { %1136 = vmax.xlane.f32.xlu2 %v1135_v37 }
 0x1f3   : > { %v1042_v38 = vsel %vm1038_vm3, %v1036_v36, -inf }
 0x1f4   : > { %1043 = vmax.xlane.f32.xlu1 %v1042_v38 }
 0x1f6   : > { %v1132_v39 = vpop.f32.mrf.mxu3 }
 0x1f7   : > { %v1133_v40 = vadd.f32 %v1132_v39, %v3116_v29 }
 0x1f9   : > { %v1138_v41 = vsel %vm1038_vm3, %v1133_v40, -inf }
 0x1fa   : > { %1139 = vmax.xlane.f32.xlu2 %v1138_v41 }
 0x20d   : > { %2623 = vrot.lane.b32.xlu1 %v3128_v42, %s3694_s20  ;;  %s3721_s20 = smov 56  }
 0x215   : > { %1282 = vrot.lane.b32.xlu1 %v3083_v17, %s3692_s23 }
 0x21d   : > { %1278 = vrot.lane.b32.xlu1 %v3083_v17, %s2811_s2 }
 0x225   : > { %1427 = vrot.lane.b32.xlu1 %v3087_v19, %s3693_s3 }
 0x22d   : > { %1423 = vrot.lane.b32.xlu1 %v3087_v19, %s2813_s26 }
 0x235   : > { %1200 = vrot.lane.b32.xlu1 %v3171_v22, %s2805_s30 }
 0x25f   : > { %v1041_v43 = vpop.xlane.xlu0 %1040 }
 0x260   : > { %v1045_v44 = vsub.f32 %v1033_v31, %v1041_v43 }
 0x262   : > { %v1047_v45 = vmul.f32 1.442695, %v1045_v44 }
 0x264   : > { %2649 = vpow2.f32 %v1047_v45 }
 0x265   : > { %v1137_v46 = vpop.xlane.xlu2 %1136 }
 0x266   : > { %v1141_v47 = vsub.f32 %v1130_v34, %v1137_v46 }
 0x267   : > { %v1044_v48 = vpop.xlane.xlu1 %1043 }
 0x268   : > { %v1143_v49 = vmul.f32 1.442695, %v1141_v47  ;;  %v1046_v50 = vsub.f32 %v1036_v36, %v1044_v48 }
 0x26a   : > { %v2650_v51 = vpop.eup %2649  ;;  %2651 = vpow2.f32 %v1143_v49  ;;  %v1049_v52 = vmul.f32 1.442695, %v1046_v50  ;;  %v1623_v50 = vld [vmem:[%s3672_s10 + $0x58] sm:$0xff] }
 0x26b   : > { %v1051_v53 = vsel %vm1038_vm3, %v2650_v51, 0.0 }
 0x26c   : > { %2653 = vpow2.f32 %v1049_v52  ;;  %1052 = vadd.xlane.f32.xlu0 %v1051_v53  ;;  %v1620_v52 = vld [vmem:[%s3672_s10 + $0x40] sm:$0xff]  ;;  %v1619_v53 = vld [vmem:[%s3672_s10 + $0x38] sm:$0xff] }
 0x26d   : > { %v1140_v61 = vpop.xlane.xlu2 %1139 }
 0x26e   : > { %v1142_v62 = vsub.f32 %v1133_v40, %v1140_v61 }
 0x270   : > { %v2652_v54 = vpop.eup %2651  ;;  %v1145_v63 = vmul.f32 1.442695, %v1142_v62  ;;  %v1613_v62 = vld [vmem:[%s3672_s10 + $0x8] sm:$0xff] }
 0x271   : > { %v1147_v57 = vsel %vm1038_vm3, %v2652_v54, 0.0 }
 0x272   : > { %v2654_v55 = vpop.eup %2653  ;;  %2655 = vpow2.f32 %v1145_v63 }
 0x273   : > { %v1054_v56 = vsel %vm1038_vm3, %v2654_v55, 0.0 }
 0x274   : > { %1055 = vadd.xlane.f32.xlu2 %v1054_v56  ;;  %1148 = vadd.xlane.f32.xlu0 %v1147_v57  ;;  %v1616_v56 = vld [vmem:[%s3672_s10 + $0x20] sm:$0xff]  ;;  %v1615_v57 = vld [vmem:[%s3672_s10 + $0x18] sm:$0xff] }
 0x278   : > { %v2656_v0 = vpop.eup %2655 }
 0x279   : > { %v1150_v1 = vsel %vm1038_vm3, %v2656_v0, 0.0 }
 0x27f   : > { %v2624_v58 = vpop.permute.xlu1 %2623 }
 0x280   : > { %v2625_v59 = vunpack.i.l.bf16 %v2624_v58  ;;  %v2626_v60 = vunpack.i.h.bf16 %v2624_v58 }
 0x282   : > { %1087 = vmatpush.msra.mxu2 %v2625_v59 }
 0x284   : > { %1088 = vmatpush.msra.mxu2 %v2626_v60  ;;  %v1614_v60 = vld [vmem:[%s3672_s10 + $0x10] sm:$0xff] }
 0x287   : > { %v1283_v6 = vpop.permute.xlu1 %1282 }
 0x288   : > { %1284 = vrot.lane.b32.xlu0 %v3087_v19, %s3692_s23  ;;  %s3717_s23 = smov 96  }
 0x28c   : > { %2628 = vrot.lane.b32.xlu2 %v3128_v42, %s3691_s27  ;;  %s3695_s27 = smov 48  }
 0x28f   : > { %v1279_v14 = vpop.permute.xlu1 %1278 }
 0x294   : > { %1280 = vrot.lane.b32.xlu2 %v3087_v19, %s2811_s2 }
 0x29c   : > { %1421 = vrot.lane.b32.xlu2 %v3083_v17, %s2813_s26 }
 0x2a4   : > { %1202 = vrot.lane.b32.xlu2 %v3164_v21, %s2805_s30 }
 0x2b2   : > { %1151 = vadd.xlane.f32.xlu0 %v1150_v1 }
 0x2c6   : > { %1425 = vrot.lane.b32.xlu0 %v3083_v17, %s3693_s3  ;;  %v1428_v17 = vpop.permute.xlu1 %1427  ;;  %s3722_s3 = smov 48  }
 0x2ce   : > { %v1424_v30 = vpop.permute.xlu1 %1423 }
 0x2d6   : > { %v1201_v49 = vpop.permute.xlu1 %1200 }
 0x2df   : > { %v1053_v2 = vpop.xlane.xlu0 %1052 }
 0x2e0   : > { %2657 = vrcp.f32 %v1053_v2 }
 0x2e6   : > { %v2658_v3 = vpop.eup %2657 }
 0x2e7   : > { %v1056_v4 = vpop.xlane.xlu2 %1055  ;;  %v1059_v5 = vmul.f32 %v2658_v3, %v2650_v51  ;;  %v1149_v7 = vpop.xlane.xlu0 %1148  ;;  %v1621_v51 = vld [vmem:[%s3672_s10 + $0x48] sm:$0xff] }
 0x2e8   : > { %2659 = vrcp.f32 %v1056_v4  ;;  %v1612_v4 = vld [vmem:[%s3672_s10] sm:$0xff] }
 0x2e9   : > { %2451 = vmatmul.msk.f32.vlgmr.msra.gmra.mxu2 %vm1038_vm3, %v1059_v5  ;;  %2661 = vrcp.f32 %v1149_v7  ;;  %v1611_v5 = vld [vmem:[%s3016_s28] sm:$0xff] }
 0x2ee   : > { %v2660_v8 = vpop.eup %2659 }
 0x2ef   : > { %v2629_v9 = vpop.permute.xlu2 %2628  ;;  %v1060_v10 = vmul.f32 %v2660_v8, %v2654_v55  ;;  %v2662_v13 = vpop.eup %2661  ;;  %v1617_v55 = vld [vmem:[%s3672_s10 + $0x28] sm:$0xff] }
 0x2f0   : > { %v2630_v11 = vunpack.i.l.bf16 %v2629_v9  ;;  %v2631_v12 = vunpack.i.h.bf16 %v2629_v9  ;;  %v1155_v15 = vmul.f32 %v2662_v13, %v2652_v54  ;;  %v1618_v54 = vld [vmem:[%s3672_s10 + $0x30] sm:$0xff] }
 0x2f1   : > { %2452 = vmatmul.msk.f32.gmra.mxu2 %vm1038_vm3, %v1060_v10 }
 0x2f2   : > { %1183 = vmatpush.msrb.mxu2 %v2630_v11 }
 0x2f4   : > { %1184 = vmatpush.msrb.mxu2 %v2631_v12 }
 0x2f7   : > { %v1281_v27 = vpop.permute.xlu2 %1280 }
 0x2f9   : > { %2457 = vmatmul.msk.f32.vlgmr.msrb.gmra.mxu2 %vm1038_vm3, %v1155_v15 }
 0x2fa   : > { %v1285_v16 = vpop.permute.xlu0 %1284 }
 0x2fb   : > { %2471 = vmatpush.xpose.msk.msra.mxu2 %vm1006_vm1, %v1285_v16 }
 0x2ff   : > { %2472 = vmatpush.xpose.msk.msra.mxu2 %vm1006_vm1, %v1283_v6  ;;  %v1422_v28 = vpop.permute.xlu2 %1421 }
 0x303   : > { %2483 = vmatpush.xpose.msk.msrb.mxu2 %vm1006_vm1, %v1428_v17 }
 0x307   : > { %v1203_v45 = vpop.permute.xlu2 %1202 }
 0x308   : > { %2459 = vmatpush.xpose.msk.msrb.mxu1 %vm1006_vm1, %v1203_v45 }
 0x30c   : > { %2460 = vmatpush.xpose.msk.msrb.mxu1 %vm1006_vm1, %v1201_v49 }
 0x325   : > { %v1152_v18 = vpop.xlane.xlu0 %1151 }
 0x326   : > { %2663 = vrcp.f32 %v1152_v18 }
 0x32c   : > { %v2664_v19 = vpop.eup %2663 }
 0x32d   : > { %v1156_v20 = vmul.f32 %v2664_v19, %v2656_v0 }
 0x32f   : > { %2458 = vmatmul.msk.f32.gmra.mxu2 %vm1038_vm3, %v1156_v20 }
 0x337   : > { %2473 = vmatmul.msk.f32.vlgmr.msra.gmra.mxu2 %vm1006_vm1, %v1279_v14 }
 0x338   : > { %v1426_v24 = vpop.permute.xlu0 %1425 }
 0x339   : > { %2484 = vmatpush.xpose.msk.msrb.mxu2 %vm1006_vm1, %v1426_v24 }
 0x33d   : > { %2496 = vmatpush.xpose.msk.msra.mxu2 %vm768_vm0, %v1623_v50 }
 0x33f   : > { %2474 = vmatmul.msk.f32.gmra.mxu2 %vm1006_vm1, %v1281_v27 }
 0x347   : > { %2485 = vmatmul.msk.f32.vlgmr.msrb.gmra.mxu2 %vm1006_vm1, %v1422_v28 }
 0x34f   : > { %2486 = vmatmul.msk.f32.gmra.mxu2 %vm1006_vm1, %v1424_v30 }
 0x36c   : > { %v1090_v31 = vpop.f32.mrf.mxu2 }
 0x36d   : > { %2469 = vmatmul.msk.f32.vlgmr.msrb.gmra.mxu3 %vm1006_vm1, %v1090_v31 }
 0x374   : > { %v1093_v32 = vpop.f32.mrf.mxu2 }
 0x375   : > { %2470 = vmatmul.msk.f32.gmra.mxu3 %vm1006_vm1, %v1093_v32 }
 0x37c   : > { %v3200_v33 = vpop.f32.mrf.mxu2 }
 0x3b2   : > { %v3202_v34 = vpop.f32.mrf.mxu2 }
 0x3ba   : > { %v1311_v35 = vpop.f32.mrf.mxu2 }
 0x3bb   : > { %v1312_v36 = vadd.f32 %v1311_v35, %v3116_v29 }
 0x3bd   : > { %v1317_v37 = vsel %vm1038_vm3, %v1312_v36, -inf }
 0x3be   : > { %1318 = vmax.xlane.f32.xlu0 %v1317_v37 }
 0x3c2   : > { %v1314_v38 = vpop.f32.mrf.mxu2 }
 0x3c3   : > { %v1315_v39 = vadd.f32 %v1314_v38, %v3116_v29 }
 0x3c5   : > { %v1320_v40 = vsel %vm1038_vm3, %v1315_v39, -inf }
 0x3c6   : > { %1321 = vmax.xlane.f32.xlu2 %v1320_v40 }
 0x3ca   : > { %v1454_v41 = vpop.f32.mrf.mxu2 }
 0x3cb   : > { %v1455_v43 = vadd.f32 %v1454_v41, %v3116_v29 }
 0x3cd   : > { %v1460_v44 = vsel %vm1038_vm3, %v1455_v43, -inf }
 0x3ce   : > { %1461 = vmax.xlane.f32.xlu1 %v1460_v44 }
 0x3d2   : > { %v1457_v46 = vpop.f32.mrf.mxu2 }
 0x3d3   : > { %v1458_v47 = vadd.f32 %v1457_v46, %v3116_v29  ;;  %v1622_v29 = vld [vmem:[%s3672_s10 + $0x50] sm:$0xff] }
 0x3d4   : > { %2497 = vmatpush.xpose.msk.msra.mxu2 %vm768_vm0, %v1622_v29 }
 0x3d5   : > { %v1463_v48 = vsel %vm1038_vm3, %v1458_v47, -inf }
 0x3d6   : > { %1464 = vmax.xlane.f32.xlu0 %v1463_v48 }
 0x3d8   : > { %2498 = vmatpush.xpose.msk.msra.mxu2 %vm768_vm0, %v1621_v51 }
 0x3dc   : > { %2499 = vmatpush.xpose.msk.msra.mxu2 %vm768_vm0, %v1620_v52 }
 0x3de   : > { %1196 = vrot.lane.b32.xlu2 %v3191_v25, %s2805_s30 }
 0x3e0   : > { %2500 = vmatpush.xpose.msk.msra.mxu2 %vm768_vm0, %v1619_v53 }
 0x3e4   : > { %2501 = vmatpush.xpose.msk.msra.mxu2 %vm768_vm0, %v1618_v54 }
 0x3e7   : > { %2633 = vrot.lane.b32.xlu1 %v3128_v42, %s3695_s27  ;;  %s3723_s27 = sld [smem:[#allocation16_spill]] }
 0x3e8   : > { %2502 = vmatpush.xpose.msk.msra.mxu2 %vm768_vm0, %v1617_v55 }
 0x3ea   : > { %1198 = vrot.lane.b32.xlu0 %v3182_v23, %s2805_s30 }
 0x3ec   : > { %2503 = vmatpush.xpose.msk.msra.mxu2 %vm768_vm0, %v1616_v56 }
 0x3f0   : > { %2504 = vmatpush.xpose.msk.msra.mxu2 %vm768_vm0, %v1615_v57 }
 0x3f4   : > { %2505 = vmatpush.xpose.msk.msra.mxu2 %vm768_vm0, %v1614_v60 }
 0x3f8   : > { %2506 = vmatpush.xpose.msk.msra.mxu2 %vm768_vm0, %v1613_v62 }
 0x3fc   : > { %2507 = vmatpush.xpose.msk.msra.mxu2 %vm768_vm0, %v1612_v4 }
 0x3ff   : > { %2508 = vmatmul.msk.f32.vlgmr.msra.gmra.mxu2 %vm768_vm0, %v1611_v5 }
 0x431   : > { %v1319_v58 = vpop.xlane.xlu0 %1318 }
 0x432   : > { %v1323_v59 = vsub.f32 %v1312_v36, %v1319_v58  ;;  %v1272_v58 = vpop.f32.mrf.mxu3 }
 0x434   : > { %v1325_v61 = vmul.f32 1.442695, %v1323_v59 }
 0x436   : > { %2665 = vpow2.f32 %v1325_v61 }
 0x439   : > { %v1322_v63 = vpop.xlane.xlu2 %1321 }
 0x43a   : > { %v1324_v0 = vsub.f32 %v1315_v39, %v1322_v63  ;;  %v1275_v59 = vpop.f32.mrf.mxu3 }
 0x43c   : > { %v2666_v1 = vpop.eup %2665  ;;  %v1327_v2 = vmul.f32 1.442695, %v1324_v0 }
 0x43d   : > { %v1329_v3 = vsel %vm1038_vm3, %v2666_v1, 0.0 }
 0x43e   : > { %2667 = vpow2.f32 %v1327_v2  ;;  %1330 = vadd.xlane.f32.xlu0 %v1329_v3 }
 0x441   : > { %v1462_v6 = vpop.xlane.xlu1 %1461  ;;  %v1197_v20 = vpop.permute.xlu2 %1196 }
 0x442   : > { %v1466_v7 = vsub.f32 %v1455_v43, %v1462_v6 }
 0x444   : > { %v2668_v8 = vpop.eup %2667  ;;  %v1468_v9 = vmul.f32 1.442695, %v1466_v7  ;;  %v2647_v7 = vld [vmem:[%s3671_s9] ss:$0 sm:$0xff] }
 0x445   : > { %v1332_v10 = vsel %vm1038_vm3, %v2668_v8, 0.0 }
 0x446   : > { %2669 = vpow2.f32 %v1468_v9  ;;  %1333 = vadd.xlane.f32.xlu2 %v1332_v10 }
 0x449   : > { %v1465_v11 = vpop.xlane.xlu0 %1464 }
 0x44a   : > { %v1467_v12 = vsub.f32 %v1458_v47, %v1465_v11 }
 0x44c   : > { %v2670_v13 = vpop.eup %2669  ;;  %v1470_v14 = vmul.f32 1.442695, %v1467_v12 }
 0x44d   : > { %v1472_v15 = vsel %vm1038_vm3, %v2670_v13, 0.0 }
 0x44e   : > { %2671 = vpow2.f32 %v1470_v14  ;;  %1473 = vadd.xlane.f32.xlu1 %v1472_v15  ;;  %v3350_v14 = vld [vmem:[%s3674_s12 + $0x10] sm:$0xff]  ;;  %v3357_v15 = vld [vmem:[%s3674_s12 + $0x8] sm:$0xff] }
 0x452   : > { %2638 = vrot.lane.b32.xlu0 %v3128_v42, %s2816_s22 }
 0x454   : > { %v2672_v16 = vpop.eup %2671 }
 0x455   : > { %v1475_v17 = vsel %vm1038_vm3, %v2672_v16, 0.0 }
 0x456   : > { %1476 = vadd.xlane.f32.xlu2 %v1475_v17 }
 0x459   : > { %v2634_v19 = vpop.permute.xlu1 %2633 }
 0x45a   : > { %1376 = vrot.lane.b32.xlu0 %v3182_v23, %s2811_s2  ;;  %v2635_v24 = vunpack.i.l.bf16 %v2634_v19  ;;  %v2636_v42 = vunpack.i.h.bf16 %v2634_v19 }
 0x45c   : > { %v1199_v18 = vpop.permute.xlu0 %1198 }
 0x45d   : > { %2461 = vmatpush.xpose.msk.msrb.mxu1 %vm1006_vm1, %v1199_v18 }
 0x461   : > { %2462 = vmatpush.xpose.msk.msrb.mxu1 %vm1006_vm1, %v1197_v20 }
 0x462   : > { %1374 = vrot.lane.b32.xlu0 %v3191_v25, %s2811_s2 }
 0x464   : > { %2463 = vmatmul.msk.f32.vlgmr.msrb.gmra.mxu1 %vm1006_vm1, %v3200_v33 }
 0x465   : > { %1365 = vmatpush.msra.mxu1 %v2635_v24 }
 0x467   : > { %1366 = vmatpush.msra.mxu1 %v2636_v42  ;;  %1380 = vrot.lane.b32.xlu1 %v3164_v21, %s2811_s2 }
 0x46a   : > { %1521 = vrot.lane.b32.xlu0 %v3171_v22, %s2813_s26 }
 0x46c   : > { %2464 = vmatmul.msk.f32.gmra.mxu1 %vm1006_vm1, %v3202_v34 }
 0x46e   : > { %1378 = vrot.lane.b32.xlu2 %v3171_v22, %s2811_s2 }
 0x46f   : > { %1523 = vrot.lane.b32.xlu1 %v3164_v21, %s2813_s26  ;;  %v2646_v21 = vld [vmem:[%s3673_s11] ss:$0 sm:$0xff] }
 0x476   : > { %1519 = vrot.lane.b32.xlu2 %v3182_v23, %s2813_s26 }
 0x477   : > { %1517 = vrot.lane.b32.xlu1 %v3191_v25, %s2813_s26 }
 0x482   : > { %v1689_v25 = vpop.f32.mrf.mxu2 }
 0x483   : > { %v3303_v35 = vadd.f32 %v2646_v21, %v1689_v25 }
 0x485   : > { %1756 = vrot.lane.b32.xlu1 %v3303_v35, %s2805_s30  ;;  %1758 = vrot.lane.b32.xlu2 %v3303_v35, %s2806_s29 }
 0x486   : > { %1693 = vrot.lane.b32.xlu0 %v3303_v35, %s3717_s23 }
 0x48d   : > { %1730 = vrot.lane.b32.xlu1 %v3303_v35, %s3718_s18  ;;  %s3739_s18 = sld [smem:[#allocation21_spill]] }
 0x493   : > { %s2296_s29 = scalar_lea.hbm %s3739_s18, %s2947_s19 }
 0x4b1   : > { %v1331_v27 = vpop.xlane.xlu0 %1330 }
 0x4b2   : > { %2673 = vrcp.f32 %v1331_v27 }
 0x4b8   : > { %v2674_v28 = vpop.eup %2673 }
 0x4b9   : > { %v1337_v30 = vmul.f32 %v2674_v28, %v2666_v1  ;;  %v1334_v31 = vpop.xlane.xlu2 %1333 }
 0x4ba   : > { %2675 = vrcp.f32 %v1334_v31 }
 0x4bb   : > { %2475 = vmatmul.msk.f32.vlgmr.msra.gmra.mxu1 %vm1038_vm3, %v1337_v30 }
 0x4c0   : > { %v2676_v32 = vpop.eup %2675 }
 0x4c1   : > { %v1474_v33 = vpop.xlane.xlu1 %1473  ;;  %v1338_v22 = vmul.f32 %v2676_v32, %v2668_v8 }
 0x4c2   : > { %2677 = vrcp.f32 %v1474_v33 }
 0x4c3   : > { %2476 = vmatmul.msk.f32.gmra.mxu1 %vm1038_vm3, %v1338_v22 }
 0x4c4   : > { %v2639_v23 = vpop.permute.xlu0 %2638 }
 0x4c5   : > { %v2640_v34 = vunpack.i.l.bf16 %v2639_v23  ;;  %v2641_v36 = vunpack.i.h.bf16 %v2639_v23 }
 0x4c7   : > { %1508 = vmatpush.msrb.mxu1 %v2640_v34 }
 0x4c8   : > { %v2678_v37 = vpop.eup %2677 }
 0x4c9   : > { %v1480_v38 = vmul.f32 %v2678_v37, %v2670_v13  ;;  %v1477_v39 = vpop.xlane.xlu2 %1476  ;;  %1509 = vmatpush.msrb.mxu1 %v2641_v36  ;;  %v3343_v13 = vld [vmem:[%s3674_s12 + $0x18] sm:$0xff] }
 0x4ca   : > { %2679 = vrcp.f32 %v1477_v39 }
 0x4cb   : > { %2487 = vmatmul.msk.f32.vlgmr.msrb.gmra.mxu1 %vm1038_vm3, %v1480_v38 }
 0x4cc   : > { %v1377_v44 = vpop.permute.xlu0 %1376 }
 0x4d0   : > { %v2680_v40 = vpop.eup %2679 }
 0x4d1   : > { %v1481_v41 = vmul.f32 %v2680_v40, %v2672_v16  ;;  %v1379_v45 = vpop.permute.xlu2 %1378  ;;  %v3364_v16 = vld [vmem:[%s3674_s12] sm:$0xff] }
 0x4d3   : > { %2488 = vmatmul.msk.f32.gmra.mxu1 %vm1038_vm3, %v1481_v41 }
 0x4d4   : > { %v1375_v46 = vpop.permute.xlu0 %1374 }
 0x4d9   : > { %v1381_v43 = vpop.permute.xlu1 %1380  ;;  %v1520_v49 = vpop.permute.xlu2 %1519 }
 0x4da   : > { %2477 = vmatpush.xpose.msk.msra.mxu3 %vm1006_vm1, %v1381_v43 }
 0x4dc   : > { %v1522_v48 = vpop.permute.xlu0 %1521 }
 0x4de   : > { %2478 = vmatpush.xpose.msk.msra.mxu3 %vm1006_vm1, %v1379_v45 }
 0x4e1   : > { %v1524_v47 = vpop.permute.xlu1 %1523  ;;  %v1235_v29 = vpop.f32.mrf.mxu1 }
 0x4e2   : > { %2479 = vmatpush.xpose.msk.msra.mxu3 %vm1006_vm1, %v1377_v44  ;;  %v1759_v52 = vpop.permute.xlu2 %1758  ;;  %v1273_v0 = vadd.f32 %v1272_v58, %v1235_v29 }
 0x4e6   : > { %2480 = vmatpush.xpose.msk.msra.mxu3 %vm1006_vm1, %v1375_v46 }
 0x4e9   : > { %v1518_v50 = vpop.permute.xlu1 %1517  ;;  %v1238_v51 = vpop.f32.mrf.mxu1 }
 0x4ea   : > { %2489 = vmatpush.xpose.msk.msrb.mxu3 %vm1006_vm1, %v1524_v47  ;;  %v1276_v1 = vadd.f32 %v1275_v59, %v1238_v51 }
 0x4ee   : > { %2490 = vmatpush.xpose.msk.msrb.mxu3 %vm1006_vm1, %v1522_v48 }
 0x4f2   : > { %2491 = vmatpush.xpose.msk.msrb.mxu3 %vm1006_vm1, %v1520_v49 }
 0x4f6   : > { %2492 = vmatpush.xpose.msk.msrb.mxu3 %vm1006_vm1, %v1518_v50 }
 0x4f7   : > { %v1757_v57 = vpop.permute.xlu1 %1756 }
 0x4f8   : > { %v1694_v10 = vpop.permute.xlu0 %1693 }
 0x4ff   : > { %v1731_v61 = vpop.permute.xlu1 %1730 }
 0x500   : > { %1751 = vmatpush.msra.mxu1 %v1731_v61 }
 0x538   : > { %v1368_v53 = vpop.f32.mrf.mxu1 }
 0x539   : > { %2481 = vmatmul.msk.f32.vlgmr.msra.gmra.mxu3 %vm1006_vm1, %v1368_v53 }
 0x53a   : > { %2512 = vmatpush.xpose.msk.msra.mxu3 %vm1006_vm1, %v1759_v52 }
 0x540   : > { %v1371_v54 = vpop.f32.mrf.mxu1 }
 0x541   : > { %2482 = vmatmul.msk.f32.gmra.mxu3 %vm1006_vm1, %v1371_v54 }
 0x548   : > { %v1511_v55 = vpop.f32.mrf.mxu1 }
 0x549   : > { %2493 = vmatmul.msk.f32.vlgmr.msrb.gmra.mxu3 %vm1006_vm1, %v1511_v55  ;;  %v1593_v55 = vsel %vm1592_vm4, %v3113_v26, 0.0 }
 0x54a   : > { %2520 = vmatpush.xpose.msk.msrb.mxu3 %vm1006_vm1, %v3343_v13 }
 0x54e   : > { %2521 = vmatpush.xpose.msk.msrb.mxu3 %vm1006_vm1, %v3350_v14 }
 0x550   : > { %v1514_v56 = vpop.f32.mrf.mxu1 }
 0x551   : > { %2494 = vmatmul.msk.f32.gmra.mxu3 %vm1006_vm1, %v1514_v56 }
 0x552   : > { %2522 = vmatpush.xpose.msk.msrb.mxu3 %vm1006_vm1, %v3357_v15 }
 0x556   : > { %2523 = vmatpush.xpose.msk.msrb.mxu3 %vm1006_vm1, %v3364_v16 }
 0x559   : > { %2513 = vmatmul.msk.f32.vlgmr.msra.gmra.mxu3 %vm1006_vm1, %v1757_v57 }
 0x5bc   : > { %v1413_v60 = vpop.f32.mrf.mxu3 }
 0x5bd   : > { %v1419_v2 = vadd.f32 %v1413_v60, %v1273_v0 }
 0x5c4   : > { %v1416_v62 = vpop.f32.mrf.mxu3 }
 0x5c5   : > { %v1420_v3 = vadd.f32 %v1416_v62, %v1276_v1 }
 0x5cc   : > { %v1556_v63 = vpop.f32.mrf.mxu3 }
 0x5cd   : > { %v1562_v5 = vadd.f32 %v1556_v63, %v1419_v2 }
 0x5cf   : > { %v1567_v9 = vadd.f32 %v2647_v7, %v1562_v5 }
 0x5d4   : > { %v1559_v4 = vpop.f32.mrf.mxu3 }
 0x5d5   : > { %v1563_v6 = vadd.f32 %v1559_v4, %v1420_v3 }
 0x5d7   : > { %v1568_v8 = vadd.f32 %v2647_v7, %v1563_v6 }
 0x5d9   : > { %1586 = vmatpush.msrb.mxu0 %v1568_v8 }
 0x5db   : > { %1587 = vmatpush.msrb.mxu0 %v1567_v9 }
 0x5dc   : > { %2495 = vmatmul.msk.f32.vlgmr.msrb.gmra.mxu0 %vm1038_vm3, %v3113_v26  ;;  %v1781_v11 = vpop.f32.mrf.mxu3 }
 0x5dd   : > { %v1784_v12 = vsel %vm1006_vm1, %v1781_v11, -inf  ;;  %2509 = vmatpush.xpose.msk.msra.mxu0 %vm1006_vm1, %v1694_v10 }
 0x5de   : > { %1785 = vmax.xlane.f32.xlu1 %v1784_v12 }
 0x5e4   : > { %2510 = vmatmul.msk.f32.vlgmr.msra.gmra.mxu0 %vm1006_vm1, %v3303_v35 }
 0x5f7   : > { %2002 = vrot.lane.b32.xlu1 %v3303_v35, %s3719_s0  ;;  %s3720_s0 = smov 80  }
 0x651   : > { %v1786_v17 = vpop.xlane.xlu1 %1785 }
 0x652   : > { %v1787_v18 = vsub.f32 %v1781_v11, %v1786_v17 }
 0x654   : > { %v1788_v20 = vmul.f32 1.442695, %v1787_v18 }
 0x656   : > { %2681 = vpow2.f32 %v1788_v20 }
 0x659   : > { %v3368_v19 = vpop.f32.mrf.mxu0 }
 0x65c   : > { %v2682_v27 = vpop.eup %2681 }
 0x65d   : > { %v1790_v28 = vsel %vm1006_vm1, %v2682_v27, 0.0 }
 0x661   : > { %v1716_v24 = vpop.f32.mrf.mxu0 }
 0x662   : > { %v1719_v42 = vsel %vm1006_vm1, %v1716_v24, -inf }
 0x663   : > { %1720 = vmax.xlane.f32.xlu0 %v1719_v42 }
 0x669   : > { %v2003_v30 = vpop.permute.xlu1 %2002 }
 0x66a   : > { %2533 = vmatpush.xpose.msk.msra.mxu3 %vm1006_vm1, %v2003_v30 }
 0x66b   : > { %1791 = vadd.xlane.f32.xlu0 %v1790_v28 }
 0x67f   : > { %1897 = vrot.lane.b32.xlu0 %v3303_v35, %s3720_s0  ;;  %s714_s0 = scalar_lea.vmem [#allocation6], %s3012_s1 }
 0x687   : > { %2000 = vrot.lane.b32.xlu0 %v3303_v35, %s2813_s26 }
 0x6d6   : > { %v1721_v31 = vpop.xlane.xlu0 %1720 }
 0x6d7   : > { %v1722_v32 = vsub.f32 %v1716_v24, %v1721_v31 }
 0x6d9   : > { %v1723_v33 = vmul.f32 1.442695, %v1722_v32 }
 0x6db   : > { %2683 = vpow2.f32 %v1723_v33 }
 0x6de   : > { %v1792_v23 = vpop.xlane.xlu0 %1791 }
 0x6df   : > { %2685 = vrcp.f32 %v1792_v23 }
 0x6e1   : > { %v2684_v22 = vpop.eup %2683 }
 0x6e2   : > { %v1725_v21 = vsel %vm1006_vm1, %v2684_v22, 0.0 }
 0x6e3   : > { %1726 = vadd.xlane.f32.xlu2 %v1725_v21  ;;  %v2118_v21 = vld [vmem:[%s3677_s15 + $0x8] sm:$0xff] }
 0x6e5   : > { %v2686_v34 = vpop.eup %2685 }
 0x6e6   : > { %v1794_v37 = vmul.f32 %v2686_v34, %v2682_v27  ;;  %v2817_v27 = vmov 0  }
 0x6e7   : > { %2642 = vset.pattern.permute.xlu1 %v2817_v27  ;;  %2643 = vset.pattern.permute.xlu2 %v2817_v27 }
 0x6e8   : > { %2644 = vset.pattern.permute.xlu0 %v2817_v27 }
 0x6f1   : > { %v1898_v40 = vpop.permute.xlu0 %1897 }
 0x6f9   : > { %v2001_v45 = vpop.permute.xlu0 %2000 }
 0x6fb   : > { %1795 = vrot.lane.b32.xlu2 %v3303_v35, %s3721_s20  ;;  %s2298_s20 = sshll.u32 %s714_s0, 4  ;;  %s2299_s20 = int_to_ptr.vmem [resolvable:$true] %s2298_s20 }
 0x703   : > { %1895 = vrot.lane.b32.xlu2 %v3303_v35, %s2811_s2 }
 0x756   : > { %v1727_v25 = vpop.xlane.xlu2 %1726 }
 0x757   : > { %2687 = vrcp.f32 %v1727_v25 }
 0x75d   : > { %v2688_v36 = vpop.eup %2687 }
 0x75e   : > { %v1729_v38 = vmul.f32 %v2688_v36, %v2684_v22  ;;  %v1796_v39 = vpop.permute.xlu2 %1795 }
 0x75f   : > { %1816 = vmatpush.msrb.mxu0 %v1796_v39  ;;  %v2117_v39 = vld [vmem:[%s3677_s15] sm:$0xff] }
 0x760   : > { %2511 = vmatmul.msk.f32.vlgmr.msra.gmra.mxu1 %vm1006_vm1, %v1729_v38  ;;  %2514 = vmatmul.msk.f32.vlgmr.msrb.gmra.mxu0 %vm1006_vm1, %v1794_v37 }
 0x761   : > { %2525 = vmatpush.xpose.msk.msra.mxu0 %vm1006_vm1, %v1898_v40 }
 0x766   : > { %v1896_v41 = vpop.permute.xlu2 %1895 }
 0x768   : > { %2526 = vmatmul.msk.f32.vlgmr.msra.gmra.mxu0 %vm1006_vm1, %v1896_v41 }
 0x7dd   : > { %v1753_v43 = vpop.f32.mrf.mxu1  ;;  %v1818_v44 = vpop.f32.mrf.mxu0 }
 0x7de   : > { %2524 = vmatmul.msk.f32.vlgmr.msrb.gmra.mxu3 %vm1006_vm1, %v1753_v43 }
 0x7e5   : > { %v1920_v46 = vpop.f32.mrf.mxu0 }
 0x7e6   : > { %2534 = vmatmul.msk.f32.vlgmr.msra.gmra.mxu3 %vm1006_vm1, %v2001_v45  ;;  %v1923_v47 = vsel %vm1006_vm1, %v1920_v46, -inf }
 0x7e7   : > { %1924 = vmax.xlane.f32.xlu2 %v1923_v47 }
 0x85a   : > { %v1925_v48 = vpop.xlane.xlu2 %1924 }
 0x85b   : > { %v1926_v49 = vsub.f32 %v1920_v46, %v1925_v48 }
 0x85d   : > { %v1927_v50 = vmul.f32 1.442695, %v1926_v49 }
 0x85f   : > { %2689 = vpow2.f32 %v1927_v50 }
 0x861   : > { %v3389_v29 = vpop.f32.mrf.mxu3 }
 0x865   : > { %v2690_v51 = vpop.eup %2689 }
 0x866   : > { %v1929_v52 = vsel %vm1006_vm1, %v2690_v51, 0.0 }
 0x867   : > { %1930 = vadd.xlane.f32.xlu1 %v1929_v52 }
 0x869   : > { %v2025_v53 = vpop.f32.mrf.mxu3 }
 0x86a   : > { %v2028_v54 = vsel %vm1006_vm1, %v2025_v53, -inf }
 0x86b   : > { %2029 = vmax.xlane.f32.xlu0 %v2028_v54 }
 0x87f   : > { %1934 = vrot.lane.b32.xlu0 %v3303_v35, %s3722_s3  ;;  %s2300_s3 = sshll.u32 %s2296_s29, 4  ;;  %s2301_s3 = int_to_ptr.hbm [resolvable:$true] %s2300_s3 }
 0x880   : > { %1831 = vrot.lane.b32.xlu1 %v3343_v13, %s2805_s30 }
 0x887   : > { %1829 = vrot.lane.b32.xlu0 %v3350_v14, %s2805_s30 }
 0x888   : > { %1966 = vrot.lane.b32.xlu1 %v3343_v13, %s2811_s2 }
 0x88f   : > { %1827 = vrot.lane.b32.xlu0 %v3357_v15, %s2805_s30 }
 0x890   : > { %1964 = vrot.lane.b32.xlu1 %v3350_v14, %s2811_s2 }
 0x897   : > { %1825 = vrot.lane.b32.xlu0 %v3364_v16, %s2805_s30  ;;  %s2560_s30 = sshll.u32 %s3063_s4, 5 }
 0x898   : > { %2065 = vrot.lane.b32.xlu1 %v3364_v16, %s2813_s26  ;;  %s3442_s23 = scalar_lea.vmem %s3723_s27, %s2560_s30 }
 0x899   : > { %v3449_v18 = vld [vmem:[%s3442_s23] sm:$0xff]  ;;  %v742_v20 = vld [vmem:[%s3442_s23 + $0x10] sm:$0xff] }
 0x89a   : > { %v798_v28 = vsel %vm797_vm7, %v3449_v18, 0.0  ;;  %v812_v30 = vsel %vm797_vm7, %v742_v20, 0.0 }
 0x89b   : > { %v799_v32 = vrot.slane %v798_v28, 4  ;;  %v813_v33 = vrot.slane %v812_v30, 4 }
 0x89d   : > { %v800_v25 = vadd.f32 %v799_v32, %v798_v28  ;;  %v814_v34 = vadd.f32 %v813_v33, %v812_v30  ;;  %v2199_v28 = vld [vmem:[%s3676_s14 + $0x10] sm:$0xff] }
 0x89f   : > { %1962 = vrot.lane.b32.xlu0 %v3357_v15, %s2811_s2  ;;  %v801_v37 = vrot.slane %v800_v25, 2  ;;  %v815_v38 = vrot.slane %v814_v34, 2 }
 0x8a1   : > { %v802_v41 = vadd.f32 %v801_v37, %v800_v25 }
 0x8a3   : > { %v803_v43 = vrot.slane %v802_v41, 1 }
 0x8a5   : > { %v804_v47 = vadd.f32 %v803_v43, %v802_v41 }
 0x8a7   : > { %828 = vperm.xlu1 %2642, %v804_v47  }
 0x8c9   : > { %1594 = vadd.xlane.f32.xlu0 %v1593_v55 }
 0x8da   : > { %v1931_v59 = vpop.xlane.xlu1 %1930 }
 0x8de   : > { %v2030_v56 = vpop.xlane.xlu0 %2029 }
 0x8df   : > { %v2031_v57 = vsub.f32 %v2025_v53, %v2030_v56 }
 0x8e1   : > { %v2032_v58 = vmul.f32 1.442695, %v2031_v57 }
 0x8e3   : > { %2691 = vpow2.f32 %v2032_v58 }
 0x8e4   : > { %2693 = vrcp.f32 %v1931_v59 }
 0x8e9   : > { %v2692_v60 = vpop.eup %2691 }
 0x8ea   : > { %v2034_v61 = vsel %vm1006_vm1, %v2692_v60, 0.0  ;;  %v2694_v62 = vpop.eup %2693 }
 0x8eb   : > { %2035 = vadd.xlane.f32.xlu2 %v2034_v61  ;;  %v1933_v63 = vmul.f32 %v2694_v62, %v2690_v51  ;;  %v743_v61 = vld [vmem:[%s3442_s23 + $0x18] sm:$0xff] }
 0x8ec   : > { %v819_v62 = vsel %vm797_vm7, %v743_v61, 0.0 }
 0x8f1   : > { %v1935_v0 = vpop.permute.xlu0 %1934 }
 0x8f2   : > { %1955 = vmatpush.msrb.mxu0 %v1935_v0  ;;  %v1832_v1 = vpop.permute.xlu1 %1831  ;;  %v820_v0 = vrot.slane %v819_v62, 4 }
 0x8f3   : > { %2527 = vmatmul.msk.f32.vlgmr.msrb.gmra.mxu0 %vm1006_vm1, %v1933_v63  ;;  %2515 = vmatpush.xpose.msk.msrb.mxu1 %vm1006_vm1, %v1832_v1  ;;  %v2276_v63 = vld [vmem:[#allocation2] sm:$0x1] }
 0x8f4   : > { %v821_v1 = vadd.f32 %v820_v0, %v819_v62 }
 0x8f9   : > { %v1830_v26 = vpop.permute.xlu0 %1829 }
 0x8fa   : > { %2516 = vmatpush.xpose.msk.msrb.mxu1 %vm1006_vm1, %v1830_v26  ;;  %v1967_v5 = vpop.permute.xlu1 %1966  ;;  %v822_v26 = vrot.slane %v821_v1, 2 }
 0x901   : > { %v1828_v2 = vpop.permute.xlu0 %1827 }
 0x902   : > { %2517 = vmatpush.xpose.msk.msrb.mxu1 %vm1006_vm1, %v1828_v2  ;;  %v1965_v7 = vpop.permute.xlu1 %1964  ;;  %v823_v2 = vadd.f32 %v822_v26, %v821_v1 }
 0x903   : > { %2039 = vrot.lane.b32.xlu2 %v3303_v35, %s2816_s22  ;;  %s3726_s22 = sld [smem:[#allocation15_spill]] }
 0x909   : > { %v1826_v3 = vpop.permute.xlu0 %1825  ;;  %s3491_s28 = scalar_lea.vmem %s3726_s22, %s2560_s30 }
 0x90a   : > { %2518 = vmatpush.xpose.msk.msrb.mxu1 %vm1006_vm1, %v1826_v3  ;;  %v2066_v51 = vpop.permute.xlu1 %2065  ;;  %v824_v3 = vrot.slane %v823_v2, 1 }
 0x90b   : > { %2071 = vrot.lane.b32.xlu2 %v3343_v13, %s2813_s26 }
 0x90d   : > { %2519 = vmatmul.msk.f32.vlgmr.msrb.gmra.mxu1 %vm1006_vm1, %v1818_v44  ;;  %v816_v44 = vadd.f32 %v815_v38, %v814_v34  ;;  %v2198_v34 = vld [vmem:[%s3676_s14 + $0x8] sm:$0xff] }
 0x90e   : > { %2528 = vmatpush.xpose.msk.msra.mxu1 %vm1006_vm1, %v1967_v5 }
 0x90f   : > { %v817_v48 = vrot.slane %v816_v44, 1 }
 0x911   : > { %v1963_v4 = vpop.permute.xlu0 %1962  ;;  %v818_v49 = vadd.f32 %v817_v48, %v816_v44 }
 0x912   : > { %2529 = vmatpush.xpose.msk.msra.mxu1 %vm1006_vm1, %v1965_v7 }
 0x913   : > { %2069 = vrot.lane.b32.xlu2 %v3350_v14, %s2813_s26  ;;  %v2120_v14 = vld [vmem:[%s3677_s15 + $0x18] sm:$0xff]  ;;  %838 = vperm.xlu1 %2642, %v818_v49  }
 0x916   : > { %2530 = vmatpush.xpose.msk.msra.mxu1 %vm1006_vm1, %v1963_v4  ;;  %v825_v4 = vadd.f32 %v824_v3, %v823_v2 }
 0x919   : > { %v829_v5 = vpop.permute.xlu1 %828 }
 0x91a   : > { %vm851_vm10 = vweird.f32 %v829_v5  ;;  %v855_v43 = vand.u32 2147483647, %v829_v5  ;;  %v857_v44 = vand.u32 2147483648, %v829_v5 }
 0x91b   : > { %2067 = vrot.lane.b32.xlu2 %v3357_v15, %s2813_s26 }
 0x91c   : > { %vm3539_vm13 = vcmp.eq.f32.partialorder %v855_v43, 8.507059e+37 }
 0x923   : > { %1960 = vrot.lane.b32.xlu2 %v3364_v16, %s2811_s2  ;;  %v2119_v16 = vld [vmem:[%s3677_s15 + $0x10] sm:$0xff]  ;;  %s3737_s2 = sld [smem:[#allocation20_spill]] }
 0x93c   : > { %v1595_v35 = vpop.xlane.xlu0 %1594 }
 0x93d   : > { %2695 = vrcp.f32 %v1595_v35  ;;  %vm1601_vm5 = vweird.f32 %v1595_v35  ;;  %v1607_v17 = vand.u32 2147483648, %v1595_v35  ;;  %v1605_v42 = vand.u32 2147483647, %v1595_v35 }
 0x93f   : > { %v1608_v23 = vor.u32 1.1754944e-38, %v1607_v17  ;;  %vm1606_vm9 = vcmp.eq.f32.partialorder %v1605_v42, 8.507059e+37 }
 0x943   : > { %v2696_v6 = vpop.eup %2695 }
 0x944   : > { %v1597_v9 = vmul.f32 %v2696_v6, %v1595_v35  ;;  %vm1602_vm6 = vweird.f32 %v2696_v6 }
 0x945   : > { %vm3455_vm8 = vmor %vm1601_vm5, %vm1602_vm6 }
 0x946   : > { %v1598_v10 = vsub.f32 1.0, %v1597_v9  ;;  %v737_v9 = vld [vmem:[%s3491_s28 + $0x8] sm:$0xff] }
 0x948   : > { %v1599_v15 = vmul.f32 %v2696_v6, %v1598_v10 }
 0x94a   : > { %v1600_v24 = vadd.f32 %v2696_v6, %v1599_v15  ;;  %v736_v15 = vld [vmem:[%s3491_s28] sm:$0xff] }
 0x94c   : > { %v1604_v36 = vsel %vm3455_vm8, %v2696_v6, %v1600_v24 }
 0x94d   : > { %v1609_v40 = vsel %vm1606_vm9, %v1608_v23, %v1604_v36 }
 0x94e   : > { %v1610_v45 = vmul.f32 %v1609_v40, %v3368_v19  ;;  %v741_v19 = vld [vmem:[%s3442_s23 + $0x8] sm:$0xff] }
 0x94f   : > { %751 = vperm.xlu1 %2642, %v741_v19   ;;  %v805_v54 = vsel %vm797_vm7, %v741_v19, 0.0  ;;  %v858_v19 = vor.u32 1.1754944e-38, %v857_v44 }
 0x950   : > { %v806_v55 = vrot.slane %v805_v54, 4 }
 0x952   : > { %v807_v56 = vadd.f32 %v806_v55, %v805_v54  ;;  %v739_v55 = vld [vmem:[%s3491_s28 + $0x18] sm:$0xff] }
 0x954   : > { %v808_v57 = vrot.slane %v807_v56, 2 }
 0x956   : > { %v809_v58 = vadd.f32 %v808_v57, %v807_v56 }
 0x957   : > { %756 = vperm.xlu1 %2642, %v742_v20   ;;  %v2200_v20 = vld [vmem:[%s3676_s14 + $0x18] sm:$0xff] }
 0x958   : > { %v810_v59 = vrot.slane %v809_v58, 1 }
 0x95e   : > { %v2036_v8 = vpop.xlane.xlu2 %2035 }
 0x95f   : > { %2697 = vrcp.f32 %v2036_v8  ;;  %2279 = vperm.xlu1 %2642, %v2276_v63  }
 0x960   : > { %2699 = vrcp.f32 %v829_v5 }
 0x965   : > { %v2698_v11 = vpop.eup %2697 }
 0x966   : > { %v2038_v12 = vmul.f32 %v2698_v11, %v2692_v60  ;;  %v2040_v13 = vpop.permute.xlu2 %2039  ;;  %v811_v60 = vadd.f32 %v810_v59, %v809_v58  ;;  %v3496_v10 = vpop.eup %2699 }
 0x967   : > { %2060 = vmatpush.msra.mxu0 %v2040_v13  ;;  %vm852_vm11 = vweird.f32 %v3496_v10 }
 0x968   : > { %2535 = vmatmul.msk.f32.vlgmr.msra.gmra.mxu0 %vm1006_vm1, %v2038_v12  ;;  %833 = vperm.xlu2 %2643, %v811_v60   ;;  %v738_v12 = vld [vmem:[%s3491_s28 + $0x10] sm:$0xff]  ;;  %vm3532_vm12 = vmor %vm851_vm10, %vm852_vm11  ;;  %vm2206_vm11 = vcmask 1041409   ;;  %s3738_s28 = sld [smem:[#allocation17_spill]] }
 0x969   : > { %2546 = vmatpush.xpose.msk.msrb.mxu0 %vm768_vm0, %v2120_v14  ;;  %v847_v14 = vmul.f32 %v3496_v10, %v829_v5 }
 0x96b   : > { %v848_v42 = vsub.f32 1.0, %v847_v14 }
 0x96d   : > { %2547 = vmatpush.xpose.msk.msrb.mxu0 %vm768_vm0, %v2119_v16  ;;  %v849_v23 = vmul.f32 %v3496_v10, %v848_v42 }
 0x96e   : > { %v2072_v22 = vpop.permute.xlu2 %2071  ;;  %s727_s30 = scalar_lea.vmem %s3738_s28, %s3063_s4  ;;  %s2288_s4 = scalar_lea.sflag [#allocation5], %s3012_s1 }
 0x96f   : > { %2536 = vmatpush.xpose.msk.msrb.mxu3 %vm1006_vm1, %v2072_v22  ;;  %v850_v41 = vadd.f32 %v3496_v10, %v849_v23  ;;  %s2757_s28 = scalar_lea.hbm %s3739_s18, 2 }
 0x970   : > { %v1957_v53 = vpop.f32.mrf.mxu0  ;;  %746 = vperm.xlu2 %2643, %v3449_v18  }
 0x971   : > { %2548 = vmatpush.xpose.msk.msrb.mxu0 %vm768_vm0, %v2118_v21 }
 0x975   : > { %2549 = vmatpush.xpose.msk.msrb.mxu0 %vm768_vm0, %v2117_v39 }
 0x976   : > { %v2070_v46 = vpop.permute.xlu2 %2069 }
 0x977   : > { %2537 = vmatpush.xpose.msk.msrb.mxu3 %vm1006_vm1, %v2070_v46  ;;  %v2124_v46 = vld [vmem:[%s3678_s16 + $0x18] sm:$0xff] }
 0x978   : > { %2550 = vmatmul.msk.f32.vlgmr.msrb.gmra.mxu0 %vm768_vm0, %v1610_v45  ;;  %843 = vperm.xlu2 %2643, %v825_v4  }
 0x979   : > { %2541 = vmatpush.xpose.msk.msrb.mxu2 %vm768_vm0, %v2124_v46 }
 0x97e   : > { %v2068_v50 = vpop.permute.xlu2 %2067 }
 0x97f   : > { %2538 = vmatpush.xpose.msk.msrb.mxu3 %vm1006_vm1, %v2068_v50 }
 0x980   : > { %761 = vperm.xlu2 %2643, %v743_v61  }
 0x983   : > { %2539 = vmatpush.xpose.msk.msrb.mxu3 %vm1006_vm1, %v2066_v51  ;;  %v854_v51 = vsel %vm3532_vm12, %v3496_v10, %v850_v41  ;;  %vm2208_vm12 = vcmask 1042434  }
 0x985   : > { %v3484_v6 = vpop.permute.xlu1 %838 }
 0x986   : > { %v1961_v52 = vpop.permute.xlu2 %1960  ;;  %v887_v54 = vand.u32 2147483648, %v3484_v6  ;;  %vm881_vm14 = vweird.f32 %v3484_v6  ;;  %v885_v2 = vand.u32 2147483647, %v3484_v6 }
 0x987   : > { %2531 = vmatpush.xpose.msk.msra.mxu1 %vm1006_vm1, %v1961_v52 }
 0x988   : > { %v888_v3 = vor.u32 1.1754944e-38, %v887_v54  ;;  %vm886_vm8 = vcmp.eq.f32.partialorder %v885_v2, 8.507059e+37 }
 0x98a   : > { %2532 = vmatmul.msk.f32.vlgmr.msra.gmra.mxu1 %vm1006_vm1, %v1957_v53 }
 0x98b   : > { %2551 = vmatpush.xpose.msk.msrb.mxu1 %vm768_vm0, %v2200_v20 }
 0x98f   : > { %2552 = vmatpush.xpose.msk.msrb.mxu1 %vm768_vm0, %v2199_v28 }
 0x993   : > { %2553 = vmatpush.xpose.msk.msrb.mxu1 %vm768_vm0, %v2198_v34 }
 0x9c1   : > { %v752_v7 = vpop.permute.xlu1 %751 }
 0x9c2   : > { %v3493_v8 = vpop.permute.xlu2 %833  ;;  %v765_v13 = vmul.f32 %v752_v7, %v737_v9 }
 0x9c3   : > { %2701 = vrcp.f32 %v3493_v8  ;;  %v870_v62 = vand.u32 2147483647, %v3493_v8  ;;  %v872_v63 = vand.u32 2147483648, %v3493_v8 }
 0x9c4   : > { %2703 = vrcp.f32 %v3484_v6  ;;  %v776_v18 = vsel %vm768_vm0, %v765_v13, 0.0 }
 0x9c5   : > { %v777_v32 = vrot.slane %v776_v18, 4  ;;  %vm871_vm7 = vcmp.eq.f32.partialorder %v870_v62, 8.507059e+37  ;;  %v873_v13 = vor.u32 1.1754944e-38, %v872_v63 }
 0x9c7   : > { %v778_v37 = vadd.f32 %v777_v32, %v776_v18 }
 0x9c9   : > { %v757_v11 = vpop.permute.xlu1 %756  ;;  %v3512_v30 = vpop.eup %2701  ;;  %v779_v48 = vrot.slane %v778_v37, 2 }
 0x9ca   : > { %v766_v16 = vmul.f32 %v757_v11, %v738_v12  ;;  %v747_v17 = vpop.permute.xlu2 %746  ;;  %v3515_v33 = vpop.eup %2703  ;;  %v862_v25 = vmul.f32 %v3512_v30, %v3493_v8  ;;  %vm867_vm2 = vweird.f32 %v3512_v30 }
 0x9cb   : > { %v764_v24 = vmul.f32 %v747_v17, %v736_v15  ;;  %v877_v36 = vmul.f32 %v3515_v33, %v3484_v6  ;;  %vm882_vm15 = vweird.f32 %v3515_v33  ;;  %v780_v58 = vadd.f32 %v779_v48, %v778_v37  ;;  %v2122_v48 = vld [vmem:[%s3678_s16 + $0x8] sm:$0xff] }
 0x9cc   : > { %v783_v27 = vsel %vm768_vm0, %v766_v16, 0.0  ;;  %v863_v45 = vsub.f32 1.0, %v862_v25  ;;  %vm3567_vm5 = vmor %vm881_vm14, %vm882_vm15 }
 0x9cd   : > { %v769_v31 = vsel %vm768_vm0, %v764_v24, 0.0  ;;  %v784_v21 = vrot.slane %v783_v27, 4  ;;  %v878_v47 = vsub.f32 1.0, %v877_v36  ;;  %v781_v7 = vrot.slane %v780_v58, 1 }
 0x9ce   : > { %v770_v22 = vrot.slane %v769_v31, 4  ;;  %v864_v53 = vmul.f32 %v3512_v30, %v863_v45 }
 0x9cf   : > { %v785_v40 = vadd.f32 %v784_v21, %v783_v27  ;;  %v879_v57 = vmul.f32 %v3515_v33, %v878_v47  ;;  %v782_v27 = vadd.f32 %v781_v7, %v780_v58  ;;  %v2123_v47 = vld [vmem:[%s3678_s16 + $0x10] sm:$0xff] }
 0x9d0   : > { %v771_v38 = vadd.f32 %v770_v22, %v769_v31  ;;  %v865_v26 = vadd.f32 %v3512_v30, %v864_v53  ;;  %2542 = vmatpush.xpose.msk.msrb.mxu2 %vm768_vm0, %v2123_v47  ;;  %v2648_v53 = vld [vmem:[%s3675_s13] ss:$0 sm:$0xff] }
 0x9d1   : > { %v786_v50 = vrot.slane %v785_v40, 2  ;;  %v880_v5 = vadd.f32 %v3515_v33, %v879_v57 }
 0x9d2   : > { %v3527_v39 = vpop.permute.xlu2 %843  ;;  %v772_v49 = vrot.slane %v771_v38, 2 }
 0x9d3   : > { %2705 = vrcp.f32 %v3527_v39  ;;  %v787_v0 = vadd.f32 %v786_v50, %v785_v40  ;;  %vm896_vm4 = vweird.f32 %v3527_v39  ;;  %v902_v14 = vand.u32 2147483648, %v3527_v39  ;;  %v2197_v40 = vld [vmem:[%s3676_s14] sm:$0xff]  ;;  %v1861_v50 = vpop.f32.mrf.mxu1 }
 0x9d4   : > { %v773_v59 = vadd.f32 %v772_v49, %v771_v38  ;;  %v900_v6 = vand.u32 2147483647, %v3527_v39  ;;  %v884_v20 = vsel %vm3567_vm5, %v3515_v33, %v880_v5  ;;  %2554 = vmatpush.xpose.msk.msrb.mxu1 %vm768_vm0, %v2197_v40  ;;  %2543 = vmatpush.xpose.msk.msrb.mxu2 %vm768_vm0, %v2122_v48  ;;  %v2121_v49 = vld [vmem:[%s3678_s16] sm:$0xff]  ;;  %v1893_v52 = vadd.f32 %v3389_v29, %v1861_v50 }
 0x9d5   : > { %v788_v15 = vrot.slane %v787_v0, 1  ;;  %v903_v32 = vor.u32 1.1754944e-38, %v902_v14  ;;  %v889_v33 = vsel %vm886_vm8, %v888_v3, %v884_v20 }
 0x9d6   : > { %v774_v10 = vrot.slane %v773_v59, 1  ;;  %vm901_vm10 = vcmp.eq.f32.partialorder %v900_v6, 8.507059e+37 }
 0x9d7   : > { %v789_v22 = vadd.f32 %v788_v15, %v787_v0 }
 0x9d8   : > { %v775_v42 = vadd.f32 %v774_v10, %v773_v59  ;;  %2544 = vmatpush.xpose.msk.msrb.mxu2 %vm768_vm0, %v2121_v49  ;;  %v2274_v10 = vld [vmem:[%s727_s30] sm:$0x1] }
 0x9d9   : > { %v2706_v56 = vpop.eup %2705  ;;  %v890_v37 = vmul.f32 %v889_v33, %v789_v22 }
 0x9da   : > { %v892_v60 = vmul.f32 %v2706_v56, %v3527_v39  ;;  %v762_v61 = vpop.permute.xlu2 %761  ;;  %vm897_vm6 = vweird.f32 %v2706_v56 }
 0x9db   : > { %v767_v1 = vmul.f32 %v762_v61, %v739_v55  ;;  %vm3581_vm9 = vmor %vm896_vm4, %vm897_vm6 }
 0x9dc   : > { %v893_v4 = vsub.f32 1.0, %v892_v60 }
 0x9dd   : > { %v790_v9 = vsel %vm768_vm0, %v767_v1, 0.0 }
 0x9de   : > { %v894_v11 = vmul.f32 %v2706_v56, %v893_v4  ;;  %v791_v12 = vrot.slane %v790_v9, 4 }
 0x9e0   : > { %v895_v17 = vadd.f32 %v2706_v56, %v894_v11  ;;  %v792_v18 = vadd.f32 %v791_v12, %v790_v9  ;;  %v2247_v9 = vld [vmem:[%s3737_s2] sm:$0x1]  ;;  %s2751_s2 = sshra.s32 %s2301_s3, 4  ;;  %s2752_s2 = int_to_ptr.hbm [resolvable:$true] %s2751_s2 }
 0x9e1   : > { %s2753_s26 = scalar_lea.hbm %s2752_s2, 1  ;;  %p2758_p1 = scmp.lt.s32.totalorder %s2752_s2, %s3739_s18 }
 0x9e2   : > { %v793_v28 = vrot.slane %v792_v18, 2  ;;  %v899_v21 = vsel %vm3581_vm9, %v2706_v56, %v895_v17  ;;  %p2754_p9 = scmp.ne.s32.totalorder %s2752_s2, %s2753_s26  ;;  %p2759_p3 = scmp.lt.s32.totalorder %s2757_s28, %s2753_s26 }
 0x9e3   : > { %v904_v38 = vsel %vm901_vm10, %v903_v32, %v899_v21 }
 0x9e4   : > { %v794_v23 = vadd.f32 %v793_v28, %v792_v18  ;;  %p2755_p13 = pnand %p2754_p9, %p2976_p11  ;;  %p2760_p4 = por %p2759_p3, %p2758_p1 }
 0x9e5   : > { %v2062_v35 = vpop.f32.mrf.mxu0 }
 0x9e6   : > { %2540 = vmatmul.msk.f32.vlgmr.msrb.gmra.mxu3 %vm1006_vm1, %v2062_v35  ;;  %vm866_vm1 = vweird.f32 %v3493_v8  ;;  %v795_v36 = vrot.slane %v794_v23, 1  ;;  %v2280_v8 = vpop.permute.xlu1 %2279  ;;  %p2756_p0 = pneg %p2755_p13 }
 0x9e7   : > { %vm3556_vm3 = vmor %vm866_vm1, %vm867_vm2  ;;  %v2282_v12 = vperm.slane %v2280_v8, 0 }
 0x9e8   : > { %v869_v16 = vsel %vm3556_vm3, %v3512_v30, %v865_v26  ;;  %v859_v30 = vsel %vm3539_vm13, %v858_v19, %v854_v51  ;;  %v796_v39 = vadd.f32 %v795_v36, %v794_v23  ;;  %vm2210_vm13 = vcmask 1043459   ;;  %v2195_v26 = vld [vmem:[%s3679_s17] sm:$0x1]  ;;  %p2761_p7 = pnand %p2760_p4, %p2756_p0 }
 0x9e9   : > { %v874_v31 = vsel %vm871_vm7, %v873_v13, %v869_v16  ;;  %v860_v25 = vmul.f32 %v859_v30, %v775_v42 }
 0x9ea   : > { %v875_v34 = vmul.f32 %v874_v31, %v782_v27  ;;  %v905_v41 = vmul.f32 %v904_v38, %v796_v39 }
 0x9ec   : > { %v2207_v43 = vsel %vm2206_vm11, %v875_v34, %v860_v25 }
 0x9ed   : > { %v2209_v44 = vsel %vm2208_vm12, %v890_v37, %v2207_v43 }
 0x9ee   : > { %v2211_v45 = vsel %vm2210_vm13, %v905_v41, %v2209_v44 }
 0x9ef   : > { %2555 = vmatmul.msk.f32.vlgmr.msrb.gmra.mxu1 %vm768_vm0, %v2211_v45 }
 0x9f5   : > { %v2192_v29 = vpop.f32.mrf.mxu0 }
 0xa07   : > { %v1996_v51 = vpop.f32.mrf.mxu1 }
 0xa08   : > { %v1999_v19 = vadd.f32 %v1996_v51, %v1893_v52 }
 0xa69   : > { %v2101_v54 = vpop.f32.mrf.mxu3 }
 0xa6a   : > { %v2104_v55 = vadd.f32 %v2101_v54, %v1999_v19 }
 0xa6c   : > { %v2108_v56 = vadd.f32 %v2648_v53, %v2104_v55  ;;  %v2243_v35 = vpop.f32.mrf.mxu1 }
 0xa6e   : > { %v2109_v57 = vsel %vm768_vm0, %v2108_v56, 0.0 }
 0xa6f   : > { %v2110_v58 = vrot.slane %v2109_v57, 4 }
 0xa71   : > { %v2111_v59 = vadd.f32 %v2110_v58, %v2109_v57 }
 0xa73   : > { %v2112_v60 = vrot.slane %v2111_v59, 2 }
 0xa75   : > { %v2113_v61 = vadd.f32 %v2112_v60, %v2111_v59 }
 0xa77   : > { %v2114_v62 = vrot.slane %v2113_v61, 1 }
 0xa79   : > { %v2115_v63 = vadd.f32 %v2114_v62, %v2113_v61 }
 0xa7b   : > { %v2116_v0 = vmul.f32 0.125, %v2115_v63 }
 0xa7d   : > { %2545 = vmatmul.msk.f32.vlgmr.msrb.gmra.mxu2 %vm768_vm0, %v2116_v0 }
 0xb00   : > { %v2157_v1 = vpop.f32.mrf.mxu2 }
 0xb01   : > { %v2193_v2 = vadd.f32 %v2192_v29, %v2157_v1 }
 0xb03   : > { %v2196_v3 = vadd.f32 %v2195_v26, %v2193_v2 }
 0xb05   : > { %v2201_v4 = vperm.slane %v2196_v3, 0 }
 0xb07   : > { %v2244_v5 = vadd.f32 %v2243_v35, %v2201_v4 }
 0xb09   : > { %v2246_v7 = vmax.f32 %v2244_v5, 0.0 }
 0xb0b   : > { %2556 = vmatpush.xpose.msk.msra.mxu3 %vm768_vm0, %v2246_v7 }
 0xb0e   : > { %2557 = vmatmul.msk.f32.vlgmr.msra.gmra.mxu3 %vm768_vm0, %v2247_v9  ;;  %vm2285_vm0 = vcmask 24576  }
 0xb91   : > { %v2271_v11 = vpop.f32.mrf.mxu3 }
 0xb92   : > { %v2275_v13 = vmul.f32 %v2274_v10, %v2271_v11 }
 0xb94   : > { %v2283_v14 = vadd.f32 %v2282_v12, %v2275_v13 }
 0xb96   : > { %v2284_v15 = vmul.f32 %v2283_v14, %v2274_v10 }
 0xb98   : > { %2286 = vst.msk [vmem:[%s714_s0] sm:$0x1] %vm2285_vm0, %v2284_v15 }
 0xb99   : > { %2764 = shalt.err (!%p2761_p7)
}
 0xb9a   : > { %2565 = dma.vmem_to_hbm [thread:$0]  (%p2976_p11), %s2299_s20, 16, %s2301_s3, %s2288_s4  }
 0xb9b PF: > { %s3741_s1 = sld [smem:[#allocation9_spill]]  ;;  %p3743_p5 = scmp.ge.s32.totalorder %s2803_s25, 2 }
 0xb9d   : > { %p2572_p8 = pnand %p3743_p5, %p2980_p12 }
 0xb9f   : > { %p2573_p10 = pneg %p2572_p8 }
 0xba1   : > { %s2312_s29 = sand.u32 1, %s3741_s1  }
 0xba2   : > { %s2313_s0 = scalar_lea.sflag [#allocation5], %s2312_s29 }
 0xba3   : > { %2786 = dma.done.wait (%p2573_p10), %s2313_s0, 16  }
 0xba4   : > { %2788 = vsyncadd (%p2573_p10), %s2313_s0, 4294967280  ;;  %s3744_s25 = sld [smem:[#allocation11_spill]]  ;;  %s3747_s23 = smov %s2795_s24 }
 0xba5   : > { %s3745_s2 = sld [smem:[#allocation10_spill]] }
 0xba6   : > { %s3746_s26 = sld [smem:[#allocation12_spill]] }
 0xbaa   : > { %p35_p2 = scmp.ge.s32.totalorder %s3744_s25, 4  }
 0xbab   : > { %s3748_s24 = smov %s3745_s2 }
 0xbac   : > { %s3749_s2 = smov %s3746_s26  ;;  %37 = sbr.rel (!%p35_p2) target bundleno = 13 (0xd), region = 160 }
 0xbb1   :  { %2318 = vsyncpa [#allocation4], 1 }
 0xbb2   :  { %2320 = vsyncpa [#allocation4 + $0x1], 1 }
 0xbb3   :  { %2321 = vsyncpa [#allocation5], 1 }
 0xbb4   :  { %2323 = vsyncpa [#allocation5 + $0x1], 1 }

</bundles_post_ra>
